<compile_context>
chip_gen: v7x
topology: tpu7x:2x2x1
jax: 0.10.0
libtpu: 0.0.40
codegen_flags: <defaults>
</compile_context>

<pallas_src>
import jax
import jax.numpy as jnp
from jax.experimental import pallas as pl
from jax.experimental.pallas import tpu as pltpu


def _round_up(x, m):
    return ((x + m - 1) // m) * m


# -----------------------------------------------------------------------------
# Kernel 1: fused 1x1-conv stack (scale-folded conv + shift + ReLU, twice)
#   x tile:  (TM, Cin) bf16
#   w1: (Cin, 256) bf16 (BN1 scale folded in)   t1: (1, 256) f32 shift
#   w2: (256, 64)  bf16 (BN2 scale folded in)   t2: (1, 64)  f32 shift
#   out tile: (TM, 64) bf16
# -----------------------------------------------------------------------------
def _conv_stack_kernel(x_ref, w1_ref, t1_ref, w2_ref, t2_ref, o_ref):
    h1 = jnp.dot(x_ref[...], w1_ref[...], preferred_element_type=jnp.float32)
    h1 = jnp.maximum(h1 + t1_ref[...], 0.0)
    h2 = jnp.dot(h1.astype(jnp.bfloat16), w2_ref[...],
                 preferred_element_type=jnp.float32)
    h2 = jnp.maximum(h2 + t2_ref[...], 0.0)
    o_ref[...] = h2.astype(o_ref.dtype)


def _pick_tile_m(n_samples, hw, max_rows=1024):
    """Rows per conv-stack tile: a whole number of samples (so it divides M
    exactly — no padding, no post-slice), 8-aligned, <= max_rows, and leaving
    >= 2 grid steps when possible so v7x's second TensorCore gets work."""
    M = n_samples * hw
    divisors = [k for k in range(1, n_samples + 1) if n_samples % k == 0]

    def ok(k):
        return (k * hw) % 8 == 0 and k * hw <= max_rows

    cands = [k for k in divisors if ok(k) and n_samples // k >= 2]
    if not cands:
        cands = [k for k in divisors if ok(k)]
    if not cands:
        return M                      # full-extent block is always legal
    return max(cands) * hw


def conv_stack(x2d, w1, t1, w2, t2, *, hw, max_rows=1024):
    """(M, Cin) bf16 -> (M, 64) bf16, tiled over M with resident weights."""
    M, Cin = x2d.shape
    C1 = w1.shape[1]
    C2 = w2.shape[1]
    tm = _pick_tile_m(M // hw, hw, max_rows)
    grid = (M // tm,)

    const = lambda r, c: pl.BlockSpec((r, c), lambda i: (0, 0))
    flops = 2 * M * (Cin * C1 + C1 * C2)
    bytes_accessed = (M * Cin * 2 + M * C2 * 2            # x stream + out
                      + Cin * C1 * 2 + C1 * C2 * 2        # weights (once)
                      + (C1 + C2) * 4)                    # shifts

    return pl.pallas_call(
        _conv_stack_kernel,
        out_shape=jax.ShapeDtypeStruct((M, C2), jnp.bfloat16),
        grid=grid,
        in_specs=[
            pl.BlockSpec((tm, Cin), lambda i: (i, 0)),     # x streams
            const(Cin, C1), const(1, C1),                  # resident w1 / t1
            const(C1, C2), const(1, C2),                   # resident w2 / t2
        ],
        out_specs=pl.BlockSpec((tm, C2), lambda i: (i, 0)),
        compiler_params=pltpu.CompilerParams(
            dimension_semantics=("parallel",)),
        cost_estimate=pl.CostEstimate(flops=flops, transcendentals=0,
                                      bytes_accessed=bytes_accessed),
    )(x2d, w1, t1, w2, t2)


# -----------------------------------------------------------------------------
# Kernel 2: final Linear layer.
#   grid = (O tiles [parallel], D tiles [arbitrary, last])
#   Accumulates directly into the VMEM-resident (N, to) output block
#   (its index map is constant across the reduction axis) — no scratch.
#   x: (N, D) bf16   w: (D, O) bf16   b: (1, O) f32   ->  (N, O) f32
# -----------------------------------------------------------------------------
def _linear_kernel(x_ref, w_ref, b_ref, o_ref):
    @pl.when(pl.program_id(1) == 0)
    def _():
        o_ref[...] = jnp.broadcast_to(b_ref[...], o_ref.shape)
    o_ref[...] += jnp.dot(x_ref[...], w_ref[...],
                          preferred_element_type=jnp.float32)


def _pick_tile_o(O):
    for to in (512, 256, 128):
        if O > to and O % to == 0:
            return to
    return O


def linear(x, w, b, *, weight_block_budget=4 << 20):
    N, D = x.shape
    O = w.shape[1]
    to = _pick_tile_o(O)

    # Single reduction step when the double-buffered (D, to) bf16 weight block
    # fits a small VMEM budget; otherwise lane-aligned chunks sized to it.
    if 2 * D * to * 2 <= weight_block_budget:
        tk, d_pad = D, D
    else:
        tk = max(128, (weight_block_budget // (2 * to * 2)) // 128 * 128)
        d_pad = _round_up(D, tk)
        if d_pad != D:                 # zero-pad reduction dim (exact result)
            x = jnp.pad(x, ((0, 0), (0, d_pad - D)))
            w = jnp.pad(w, ((0, d_pad - D), (0, 0)))

    grid = (O // to, d_pad // tk)
    flops = 2 * N * d_pad * O
    bytes_accessed = ((O // to) * N * d_pad * 2   # x re-read per O tile
                      + d_pad * O * 2 + N * O * 4 + O * 4)

    return pl.pallas_call(
        _linear_kernel,
        out_shape=jax.ShapeDtypeStruct((N, O), jnp.float32),
        grid=grid,
        in_specs=[
            pl.BlockSpec((N, tk), lambda o, k: (0, k)),    # activation chunk
            pl.BlockSpec((tk, to), lambda o, k: (k, o)),   # weight chunk
            pl.BlockSpec((1, to), lambda o, k: (0, o)),    # bias tile
        ],
        out_specs=pl.BlockSpec((N, to), lambda o, k: (0, o)),
        compiler_params=pltpu.CompilerParams(
            dimension_semantics=("parallel", "arbitrary")),
        cost_estimate=pl.CostEstimate(flops=flops, transcendentals=0,
                                      bytes_accessed=bytes_accessed),
    )(x, w, b)


# -----------------------------------------------------------------------------
# One-time parameter preparation (runs OUTSIDE the jitted forward).
#   - folds BN (eval-mode running stats) into the conv weights/shifts,
#   - folds PyTorch's C-major flatten into the Linear weight columns,
#   - casts MXU operands to bf16 (fold done in f32, cast last).
# -----------------------------------------------------------------------------
def prepare_params(params, H, W, eps=1e-5):
    HW = H * W
    O = params["lin_w"].shape[0]

    def fold(conv_w, conv_b, gamma, beta, mean, var):
        cout, cin = conv_w.shape[0], conv_w.shape[1]
        scale = gamma / jnp.sqrt(var + eps)                       # (Cout,)
        w = conv_w.reshape(cout, cin).T * scale[None, :]          # (Cin, Cout)
        shift = beta + scale * (conv_b - mean)                    # (Cout,)
        return (w.astype(jnp.bfloat16),
                shift[None, :].astype(jnp.float32))

    w1, t1 = fold(params["conv1_w"], params["conv1_b"], params["bn1_gamma"],
                  params["bn1_beta"], params["bn1_mean"], params["bn1_var"])
    w2, t2 = fold(params["conv2_w"], params["conv2_b"], params["bn2_gamma"],
                  params["bn2_beta"], params["bn2_mean"], params["bn2_var"])

    # wlin[hw*64 + c, o] = lin_w[o, c*HW + hw]  (so the NHWC-order activation
    # flatten needs no relayout before the Linear).
    wlin = jnp.transpose(params["lin_w"].reshape(O, 64, HW),
                         (2, 1, 0)).reshape(HW * 64, O).astype(jnp.bfloat16)
    blin = params["lin_b"][None, :].astype(jnp.float32)
    return {"w1": w1, "t1": t1, "w2": w2, "t2": t2,
            "wlin": wlin, "blin": blin}


# -----------------------------------------------------------------------------
# FeatureFlat forward: layout glue + two Pallas kernels.
# -----------------------------------------------------------------------------
@jax.jit
def feature_flat_forward(frames_nchw, prepped):
    N, Cin, H, W = frames_nchw.shape
    HW = H * W

    # NCHW -> (N*HW, Cin) channels-last rows, cast to bf16 (fused with the
    # transpose by XLA so the only big streaming operand enters at 2 B/elem).
    x2d = jnp.transpose(frames_nchw, (0, 2, 3, 1)).reshape(
        N * HW, Cin).astype(jnp.bfloat16)

    h = conv_stack(x2d, prepped["w1"], prepped["t1"],
                   prepped["w2"], prepped["t2"], hw=HW)       # (N*HW, 64) bf16

    h_flat = h.reshape(N, HW * 64)                            # NHWC flatten
    return linear(h_flat, prepped["wlin"], prepped["blin"])   # (N, O) f32


# Pure-JAX f32 reference for self-checking (matches the PyTorch module).
def feature_flat_reference(frames_nchw, params):
    N, Cin, H, W = frames_nchw.shape
    eps = 1e-5
    x = frames_nchw.astype(jnp.float32)

    def conv_bn_relu(x, w, b, gamma, beta, mean, var):
        y = jnp.einsum("nchw,oc->nohw", x, w)
        y = y + b[None, :, None, None]
        y = (y - mean[None, :, None, None]) / jnp.sqrt(
            var[None, :, None, None] + eps)
        y = y * gamma[None, :, None, None] + beta[None, :, None, None]
        return jnp.maximum(y, 0.0)

    h = conv_bn_relu(x, params["conv1_w"].reshape(256, Cin),
                     params["conv1_b"], params["bn1_gamma"],
                     params["bn1_beta"], params["bn1_mean"], params["bn1_var"])
    h = conv_bn_relu(h, params["conv2_w"].reshape(64, 256),
                     params["conv2_b"], params["bn2_gamma"],
                     params["bn2_beta"], params["bn2_mean"], params["bn2_var"])
    flat = h.reshape(N, -1)
    return flat @ params["lin_w"].T + params["lin_b"][None, :]


def init_params(key, cin, h, output_size):
    d = 64 * h * h
    ks = jax.random.split(key, 8)
    p = {
        # Conv weights kept in PyTorch layout (Cout, Cin, 1, 1).
        "conv1_w": 0.05 * jax.random.normal(ks[0], (256, cin, 1, 1), jnp.float32),
        "conv1_b": 0.05 * jax.random.normal(ks[1], (256,), jnp.float32),
        "bn1_gamma": 1.0 + 0.05 * jax.random.normal(ks[2], (256,), jnp.float32),
        "bn1_beta": 0.05 * jax.random.normal(ks[3], (256,), jnp.float32),
        "bn1_mean": jnp.zeros((256,), jnp.float32),
        "bn1_var": jnp.ones((256,), jnp.float32),
        "conv2_w": 0.05 * jax.random.normal(ks[4], (64, 256, 1, 1), jnp.float32),
        "conv2_b": 0.05 * jax.random.normal(ks[5], (64,), jnp.float32),
        "bn2_gamma": 1.0 + 0.05 * jax.random.normal(ks[6], (64,), jnp.float32),
        "bn2_beta": 0.05 * jax.random.normal(ks[7], (64,), jnp.float32),
        "bn2_mean": jnp.zeros((64,), jnp.float32),
        "bn2_var": jnp.ones((64,), jnp.float32),
    }
    klin = jax.random.split(ks[0], 2)
    p["lin_w"] = 0.02 * jax.random.normal(klin[0], (output_size, d), jnp.float32)
    p["lin_b"] = 0.02 * jax.random.normal(klin[1], (output_size,), jnp.float32)
    return p


if __name__ == "__main__":
    # Small shapes consistent with FeatureFlat(input_shape=(Cin,H,W), output_size).
    N, Cin, H, W = 2, 32, 8, 8
    OUTPUT_SIZE = 32

    key = jax.random.PRNGKey(0)
    kx, kp = jax.random.split(key)
    frames = jax.random.normal(kx, (N, Cin, H, W), jnp.float32)   # NCHW input
    params = init_params(kp, Cin, H, OUTPUT_SIZE)

    # One-time parameter prep (BN fold, flatten fold, bf16 casts) outside jit.
    prepped = jax.tree_util.tree_map(
        jax.block_until_ready, prepare_params(params, H, W))

    out = feature_flat_forward(frames, prepped)
    out = jax.block_until_ready(out)

    ref = feature_flat_reference(frames, params)
    assert out.shape == (N, OUTPUT_SIZE)
    # bf16 MXU operands (f32 accumulation) -> loosened tolerance vs f32 ref.
    assert jnp.allclose(out, ref, atol=2e-2, rtol=2e-2), (
        "max abs err = %f" % float(jnp.max(jnp.abs(out - ref))))

    print("KERNEL_OK")
</pallas_src>

<mosaic_0001>
module attributes {stable_mosaic.version = 11 : i64} {
  func.func @_conv_stack_kernel(%arg0: i32, %arg1: memref<64x32xbf16, #tpu.memory_space<vmem>>, %arg2: memref<32x256xbf16, #tpu.memory_space<vmem>>, %arg3: memref<1x256xf32, #tpu.memory_space<vmem>>, %arg4: memref<256x64xbf16, #tpu.memory_space<vmem>>, %arg5: memref<1x64xf32, #tpu.memory_space<vmem>>, %arg6: memref<64x64xbf16, #tpu.memory_space<vmem>>) attributes {dimension_semantics = [#tpu.dimension_semantics<parallel>], iteration_bounds = array<i64: 2>, scalar_prefetch = 0 : i64, scratch_operands = 0 : i64, tpu.core_type = #tpu.core_type<tc>, window_params = [{transform_indices = @transform_0, window_bounds = array<i64: 64, 32>}, {pipeline_mode = #tpu.pipeline_mode<synchronous>, transform_indices = @transform_1, window_bounds = array<i64: 32, 256>}, {pipeline_mode = #tpu.pipeline_mode<synchronous>, transform_indices = @transform_2, window_bounds = array<i64: 1, 256>}, {pipeline_mode = #tpu.pipeline_mode<synchronous>, transform_indices = @transform_3, window_bounds = array<i64: 256, 64>}, {pipeline_mode = #tpu.pipeline_mode<synchronous>, transform_indices = @transform_4, window_bounds = array<i64: 1, 64>}, {transform_indices = @transform_5, window_bounds = array<i64: 64, 64>}]} {
    %c0 = arith.constant 0 : index
    %c0_0 = arith.constant 0 : index
    %0 = vector.load %arg1[%c0, %c0_0] : memref<64x32xbf16, #tpu.memory_space<vmem>>, vector<64x32xbf16>
    %c0_1 = arith.constant 0 : index
    %c0_2 = arith.constant 0 : index
    %1 = vector.load %arg2[%c0_1, %c0_2] : memref<32x256xbf16, #tpu.memory_space<vmem>>, vector<32x256xbf16>
    %cst = arith.constant dense<0.000000e+00> : vector<64x256xf32>
    %2 = tpu.matmul %0, %1, %cst {dimension_numbers = #tpu.dot_dimension_numbers<[1], [0], [0], [1], [0, 0, 1, 1], [], []>} : vector<64x32xbf16>, vector<32x256xbf16>, vector<64x256xf32> -> vector<64x256xf32>
    %c0_3 = arith.constant 0 : index
    %c0_4 = arith.constant 0 : index
    %3 = vector.load %arg3[%c0_3, %c0_4] : memref<1x256xf32, #tpu.memory_space<vmem>>, vector<1x256xf32>
    %4 = vector.broadcast %3 : vector<1x256xf32> to vector<64x256xf32>
    %5 = arith.addf %2, %4 : vector<64x256xf32>
    %cst_5 = arith.constant 0.000000e+00 : f32
    %6 = vector.broadcast %cst_5 : f32 to vector<64x256xf32>
    %7 = arith.maximumf %5, %6 : vector<64x256xf32>
    %8 = arith.truncf %7 : vector<64x256xf32> to vector<64x256xbf16>
    %c0_6 = arith.constant 0 : index
    %c0_7 = arith.constant 0 : index
    %9 = vector.load %arg4[%c0_6, %c0_7] : memref<256x64xbf16, #tpu.memory_space<vmem>>, vector<256x64xbf16>
    %cst_8 = arith.constant dense<0.000000e+00> : vector<64x64xf32>
    %10 = tpu.matmul %8, %9, %cst_8 {dimension_numbers = #tpu.dot_dimension_numbers<[1], [0], [0], [1], [0, 0, 1, 1], [], []>} : vector<64x256xbf16>, vector<256x64xbf16>, vector<64x64xf32> -> vector<64x64xf32>
    %c0_9 = arith.constant 0 : index
    %c0_10 = arith.constant 0 : index
    %11 = vector.load %arg5[%c0_9, %c0_10] : memref<1x64xf32, #tpu.memory_space<vmem>>, vector<1x64xf32>
    %12 = vector.broadcast %11 : vector<1x64xf32> to vector<64x64xf32>
    %13 = arith.addf %10, %12 : vector<64x64xf32>
    %cst_11 = arith.constant 0.000000e+00 : f32
    %14 = vector.broadcast %cst_11 : f32 to vector<64x64xf32>
    %15 = arith.maximumf %13, %14 : vector<64x64xf32>
    %16 = arith.truncf %15 : vector<64x64xf32> to vector<64x64xbf16>
    %c0_12 = arith.constant 0 : index
    %c0_13 = arith.constant 0 : index
    %17 = vector.load %arg6[%c0_12, %c0_13] : memref<64x64xbf16, #tpu.memory_space<vmem>>, vector<64x64xbf16>
    tpu.vector_store %arg6[%c0_12, %c0_13], %16 {strides = array<i32>} : memref<64x64xbf16, #tpu.memory_space<vmem>>, vector<64x64xbf16>,
    return
  }
  func.func @transform_0(%arg0: i32) -> (i32, i32) {
    %c0_i32 = arith.constant 0 : i32
    %c0_i32_0 = arith.constant 0 : i32
    return %arg0, %c0_i32 : i32, i32
  }
  func.func @transform_1(%arg0: i32) -> (i32, i32) {
    %c0_i32 = arith.constant 0 : i32
    %c0_i32_0 = arith.constant 0 : i32
    %c0_i32_1 = arith.constant 0 : i32
    return %c0_i32, %c0_i32_0 : i32, i32
  }
  func.func @transform_2(%arg0: i32) -> (i32, i32) {
    %c0_i32 = arith.constant 0 : i32
    %c0_i32_0 = arith.constant 0 : i32
    %c0_i32_1 = arith.constant 0 : i32
    return %c0_i32, %c0_i32_0 : i32, i32
  }
  func.func @transform_3(%arg0: i32) -> (i32, i32) {
    %c0_i32 = arith.constant 0 : i32
    %c0_i32_0 = arith.constant 0 : i32
    %c0_i32_1 = arith.constant 0 : i32
    return %c0_i32, %c0_i32_0 : i32, i32
  }
  func.func @transform_4(%arg0: i32) -> (i32, i32) {
    %c0_i32 = arith.constant 0 : i32
    %c0_i32_0 = arith.constant 0 : i32
    %c0_i32_1 = arith.constant 0 : i32
    return %c0_i32, %c0_i32_0 : i32, i32
  }
  func.func @transform_5(%arg0: i32) -> (i32, i32) {
    %c0_i32 = arith.constant 0 : i32
    %c0_i32_0 = arith.constant 0 : i32
    return %arg0, %c0_i32 : i32, i32
  }
}

module attributes {stable_mosaic.version = 11 : i64} {
  func.func @_linear_kernel(%arg0: i32, %arg1: i32, %arg2: memref<2x4096xbf16, #tpu.memory_space<vmem>>, %arg3: memref<4096x32xbf16, #tpu.memory_space<vmem>>, %arg4: memref<1x32xf32, #tpu.memory_space<vmem>>, %arg5: memref<2x32xf32, #tpu.memory_space<vmem>>) attributes {dimension_semantics = [#tpu.dimension_semantics<parallel>, #tpu.dimension_semantics<arbitrary>], iteration_bounds = array<i64: 1, 1>, scalar_prefetch = 0 : i64, scratch_operands = 0 : i64, tpu.core_type = #tpu.core_type<tc>, window_params = [{transform_indices = @transform_0, window_bounds = array<i64: 2, 4096>}, {transform_indices = @transform_1, window_bounds = array<i64: 4096, 32>}, {transform_indices = @transform_2, window_bounds = array<i64: 1, 32>}, {transform_indices = @transform_3, window_bounds = array<i64: 2, 32>}]} {
    %c0_i32 = arith.constant 0 : i32
    %0 = arith.cmpi eq, %arg1, %c0_i32 : i32
    %1 = arith.extui %0 : i1 to i32
    %c0_i32_0 = arith.constant 0 : i32
    %2 = arith.cmpi ne, %1, %c0_i32_0 : i32
    scf.if %2 {
      %c0_8 = arith.constant 0 : index
      %c0_9 = arith.constant 0 : index
      %9 = vector.load %arg4[%c0_8, %c0_9] : memref<1x32xf32, #tpu.memory_space<vmem>>, vector<1x32xf32>
      %10 = vector.shape_cast %9 : vector<1x32xf32> to vector<1x32xf32>
      %11 = vector.broadcast %10 : vector<1x32xf32> to vector<2x32xf32>
      %c0_10 = arith.constant 0 : index
      %c0_11 = arith.constant 0 : index
      %12 = vector.load %arg5[%c0_10, %c0_11] : memref<2x32xf32, #tpu.memory_space<vmem>>, vector<2x32xf32>
      tpu.vector_store %arg5[%c0_10, %c0_11], %11 {strides = array<i32>} : memref<2x32xf32, #tpu.memory_space<vmem>>, vector<2x32xf32>,
    } else {
    }
    %c0 = arith.constant 0 : index
    %c0_1 = arith.constant 0 : index
    %3 = vector.load %arg5[%c0, %c0_1] : memref<2x32xf32, #tpu.memory_space<vmem>>, vector<2x32xf32>
    %c0_2 = arith.constant 0 : index
    %c0_3 = arith.constant 0 : index
    %4 = vector.load %arg2[%c0_2, %c0_3] : memref<2x4096xbf16, #tpu.memory_space<vmem>>, vector<2x4096xbf16>
    %c0_4 = arith.constant 0 : index
    %c0_5 = arith.constant 0 : index
    %5 = vector.load %arg3[%c0_4, %c0_5] : memref<4096x32xbf16, #tpu.memory_space<vmem>>, vector<4096x32xbf16>
    %cst = arith.constant dense<0.000000e+00> : vector<2x32xf32>
    %6 = tpu.matmul %4, %5, %cst {dimension_numbers = #tpu.dot_dimension_numbers<[1], [0], [0], [1], [0, 0, 1, 1], [], []>} : vector<2x4096xbf16>, vector<4096x32xbf16>, vector<2x32xf32> -> vector<2x32xf32>
    %7 = arith.addf %3, %6 : vector<2x32xf32>
    %c0_6 = arith.constant 0 : index
    %c0_7 = arith.constant 0 : index
    %8 = vector.load %arg5[%c0_6, %c0_7] : memref<2x32xf32, #tpu.memory_space<vmem>>, vector<2x32xf32>
    tpu.vector_store %arg5[%c0_6, %c0_7], %7 {strides = array<i32>} : memref<2x32xf32, #tpu.memory_space<vmem>>, vector<2x32xf32>,
    return
  }
  func.func @transform_0(%arg0: i32, %arg1: i32) -> (i32, i32) {
    %c0_i32 = arith.constant 0 : i32
    %c0_i32_0 = arith.constant 0 : i32
    return %c0_i32, %arg1 : i32, i32
  }
  func.func @transform_1(%arg0: i32, %arg1: i32) -> (i32, i32) {
    %c0_i32 = arith.constant 0 : i32
    return %arg1, %arg0 : i32, i32
  }
  func.func @transform_2(%arg0: i32, %arg1: i32) -> (i32, i32) {
    %c0_i32 = arith.constant 0 : i32
    %c0_i32_0 = arith.constant 0 : i32
    return %c0_i32, %arg0 : i32, i32
  }
  func.func @transform_3(%arg0: i32, %arg1: i32) -> (i32, i32) {
    %c0_i32 = arith.constant 0 : i32
    %c0_i32_0 = arith.constant 0 : i32
    return %c0_i32, %arg0 : i32, i32
  }
}

</mosaic_0001>

<bundles_post_ra>
// kernel: feature_flat_forward.2
= control target key start
LH: loop header
LB: loop body
LE: loop exit
PB: predicated region body
PF: predicated region fallthrough
CT: control target
= control target key end

     0   :  { %10 = vsyncpa [#allocation3], 0  ;;  %s1306_s0 = inlined_call_operand.vmem [shape: bf16[128,32], index: 0, kind: input, shape index: {}]   ;;  %s1307_s1 = inlined_call_operand.hbm [shape: bf16[32,256], index: 1, kind: input, shape index: {}]   ;;  %s1308_s2 = inlined_call_operand.hbm [shape: f32[1,256], index: 2, kind: input, shape index: {}]   ;;  %s1309_s3 = inlined_call_operand.vmem [shape: bf16[256,64], index: 3, kind: input, shape index: {}]   ;;  %s1310_s4 = inlined_call_operand.hbm [shape: f32[1,64], index: 4, kind: input, shape index: {}]   ;;  %s1311_s5 = inlined_call_operand.vmem [shape: bf16[128,64], index: 5, kind: output, shape index: {}]  }
   0x1   :  { %11 = vsyncpa [#allocation5], 0  ;;  %s1101_s18 = smov 0  }
   0x2 LB: > { %s1065_s19 = smov [#allocation4]   ;;  %s779_s21 = sadd.s32 4294967295, %s1063_s18   ;;  %s1063_s18 = sphi %s1101_s18, %s17_s18  }
   0x3   : > { %s184_s20 = sshll.u32 %s1065_s19, 4  ;;  %p781_p0 = scmp.ge.s32.totalorder %s1063_s18, 1  ;;  %s185_s20 = int_to_ptr.vmem [resolvable:$true] %s184_s20 }
   0x4   : > { %p158_p1 = scmp.lt.s32.totalorder %s1063_s18, 3  ;;  %p1111_p2 = scmp.eq.s32.totalorder %s779_s21, 0 }
   0x5   : > { %s1066_s24 = smov [#allocation2]   ;;  %s1067_s27 = smov [#allocation6]  }
   0x6   : > { %s1315_s22 = scalar_select %p1111_p2, 1, 0 }
   0x7   : > { %p1115_p3 = pnand %p781_p0, %p158_p1  ;;  %s170_s25 = sshll.u32 %s1066_s24, 4  ;;  %s1127_s25 = int_to_ptr.vmem [resolvable:$true] %s170_s25 }
   0x8   : > { %s198_s28 = sshll.u32 %s1067_s27, 4  ;;  %s965_s6 = scalar_lea.hbm %s1308_s2, 32  ;;  %s1129_s28 = int_to_ptr.vmem [resolvable:$true] %s198_s28 }
   0x9   : > { %s1316_s23 = scalar_select %p1115_p3, 1, 0 }
   0xa   : > { %p909_p4 = pneg %p1115_p3  ;;  %p966_p6 = scmp.ne.s32.totalorder %s1308_s2, %s965_s6 }
   0xb   : > { %p972_p10 = scmp.lt.u32.totalorder %s965_s6, %s1308_s2 }
   0xc   : > { %p1123_p5 = pnand %p1111_p2, %p909_p4 }
   0xe   : > { %p1139_p7 = pneg %p1123_p5 }
  0x10   : > { %p968_p8 = pnand %p1139_p7, %p966_p6 }
  0x12   : > { %p969_p9 = pneg %p968_p8 }
  0x14   : > { %p974_p11 = pnand %p972_p10, %p969_p9 }
  0x16   : > { %977 = shalt.err (!%p974_p11)
}
  0x17   : > { %s978_s12 = scalar_lea.vmem %s185_s20, 32  ;;  %p986_p1 = scmp.lt.s32.totalorder %s185_s20, %s185_s20 }
  0x18   : > { %p979_p12 = scmp.ne.s32.totalorder %s185_s20, %s978_s12  ;;  %p987_p4 = scmp.lt.s32.totalorder %s978_s12, %s978_s12 }
  0x1a   : > { %p981_p13 = pnand %p979_p12, %p1139_p7  ;;  %p988_p2 = por %p987_p4, %p986_p1 }
  0x1c   : > { %p982_p0 = pneg %p981_p13 }
  0x1e   : > { %p989_p3 = pnand %p988_p2, %p982_p0 }
  0x20   : > { %992 = shalt.err (!%p989_p3)
}
  0x21   : > { %915 = dma.hbm_to_vmem [thread:$0]  (!%p1123_p5), %s1308_s2, 32, %s185_s20, [#allocation5]  }
  0x22   : > { %s993_s17 = scalar_lea.hbm %s1307_s1, 512 }
  0x23   : > { %p994_p6 = scmp.ne.s32.totalorder %s1307_s1, %s993_s17  ;;  %p1000_p2 = scmp.lt.u32.totalorder %s993_s17, %s1307_s1 }
  0x25   : > { %p996_p8 = pnand %p994_p6, %p1139_p7 }
  0x27   : > { %p997_p9 = pneg %p996_p8 }
  0x29   : > { %p1002_p3 = pnand %p1000_p2, %p997_p9 }
  0x2b   : > { %1005 = shalt.err (!%p1002_p3)
}
  0x2c   : > { %s1006_s20 = scalar_lea.vmem %s1127_s25, 512  ;;  %p1014_p13 = scmp.lt.s32.totalorder %s1127_s25, %s1127_s25 }
  0x2d   : > { %p1007_p10 = scmp.ne.s32.totalorder %s1127_s25, %s1006_s20  ;;  %p1015_p0 = scmp.lt.s32.totalorder %s1006_s20, %s1006_s20 }
  0x2f   : > { %p1009_p11 = pnand %p1007_p10, %p1139_p7  ;;  %p1016_p1 = por %p1015_p0, %p1014_p13 }
  0x31   : > { %p1010_p12 = pneg %p1009_p11 }
  0x33   : > { %p1017_p4 = pnand %p1016_p1, %p1010_p12 }
  0x35   : > { %1020 = shalt.err (!%p1017_p4)
}
  0x36   : > { %s1068_s30 = smov 128   ;;  %s1069_s6 = smov 8  }
  0x37   : > { %912 = dma.hbm_to_vmem [thread:$0]  (!%p1123_p5), %s1307_s1, 512, %s1127_s25, [#allocation3], %s1068_s30, %s1068_s30, %s1069_s6  }
  0x38   : > { %s1021_s12 = scalar_lea.hbm %s1310_s4, 16 }
  0x39   : > { %p1022_p6 = scmp.ne.s32.totalorder %s1310_s4, %s1021_s12  ;;  %p1028_p2 = scmp.lt.u32.totalorder %s1021_s12, %s1310_s4 }
  0x3b   : > { %p1024_p8 = pnand %p1022_p6, %p1139_p7 }
  0x3d   : > { %p1025_p9 = pneg %p1024_p8 }
  0x3f   : > { %p1030_p3 = pnand %p1028_p2, %p1025_p9 }
  0x41   : > { %1033 = shalt.err (!%p1030_p3)
}
  0x42   : > { %s1034_s25 = scalar_lea.vmem %s1129_s28, 16  ;;  %s1041_s17 = scalar_lea.vmem %s1129_s28, 32 }
  0x43   : > { %p1035_p10 = scmp.ne.s32.totalorder %s1129_s28, %s1034_s25  ;;  %p1042_p13 = scmp.lt.s32.totalorder %s1129_s28, %s1129_s28 }
  0x44   : > { %p1043_p0 = scmp.lt.s32.totalorder %s1041_s17, %s1034_s25 }
  0x45   : > { %p1037_p11 = pnand %p1035_p10, %p1139_p7 }
  0x46   : > { %p1044_p1 = por %p1043_p0, %p1042_p13 }
  0x47   : > { %p1038_p12 = pneg %p1037_p11 }
  0x49   : > { %p1045_p4 = pnand %p1044_p1, %p1038_p12 }
  0x4b   : > { %1048 = shalt.err (!%p1045_p4)
}
  0x4c   : > { %918 = dma.hbm_to_vmem [thread:$0]  (!%p1123_p5), %s1310_s4, 16, %s1129_s28, [#allocation5]  }
  0x4d   : > { %p1319_p6 = scmp.ne.s32.totalorder %s1316_s23, 0 }
  0x4e   : > { %p1320_p7 = scmp.ne.s32.totalorder (!%p1319_p6), %s1315_s22, 0 }
  0x4f   : > { %220 = sbr.rel (%p1319_p6) target bundleno = 568 (0x238), region = 40 }
  0x56   : > { %1054 = dma.done.wait (%p1320_p7), [#allocation3], 512  }
  0x57   : > { %1056 = vsyncadd (%p1320_p7), [#allocation3], 4294966784 }
  0x58   : > { %1058 = dma.done.wait (%p1320_p7), [#allocation5], 48  }
  0x59   : > { %1060 = vsyncadd (%p1320_p7), [#allocation5], 4294967248  ;;  %s790_s26 = sshll.u32 %s779_s21, 3  ;;  %v1070_v0 = vmov 0   ;;  %v939_v1 = vld [vmem:[#allocation2 + $0x4] ss:$8 sps:$4 sm:$0xff]   ;;  %v283_v25 = vlaneseq }
  0x5a   : > { %378 = vmatprep.mubr.bf16.mxu0 %v1070_v0  ;;  %p257_p5 = scmp.lt.s32.totalorder %s790_s26, 15  ;;  %v941_v2 = vld [vmem:[#allocation2] ss:$8 sps:$4 sm:$0xff]   ;;  %346 = vmatprep.subr.bf16.mxu0 %v939_v1  ;;  %v942_v3 = vld [vmem:[#allocation2 + $0x14] ss:$8 sps:$4 sm:$0xff]   ;;  %vm333_vm0 = vcmask 261120  }
  0x5b   : > { %347 = vmatpush1.bf16.msra.mxu0 %v941_v2  ;;  %v944_v4 = vld [vmem:[#allocation2 + $0x10] ss:$8 sps:$4 sm:$0xff]   ;;  %v949_v6 = vld [vmem:[%s1309_s3 + $0x40] sm:$0xff]   ;;  %v951_v8 = vld [vmem:[%s1309_s3 + $0x48] sm:$0xff]   ;;  %v284_v26 = vshrl.u32 %v283_v25, 7  ;;  %vm683_vm1 = vcmask 519168  }
  0x5c   : > { %s1322_s26 = smov (!%p257_p5, %s790_s26), 15  ;;  %348 = vmatprep.subr.bf16.mxu0 %v942_v3  ;;  %v950_v7 = vld [vmem:[%s1309_s3] sm:$0xff]   ;;  %881 = vmatprep.subr.bf16.mxu1 %v949_v6  ;;  %v952_v9 = vld [vmem:[%s1309_s3 + $0x8] sm:$0xff]   ;;  %v953_v10 = vld [vmem:[%s1309_s3 + $0x50] sm:$0xff]  }
  0x5d   : > { %s791_s23 = sshll.u32 %s1322_s26, 2  ;;  %889 = vmatpush3.bf16.msra.mxu1 %v950_v7  ;;  %v954_v12 = vld [vmem:[%s1309_s3 + $0x10] sm:$0xff]   ;;  %v955_v13 = vld [vmem:[%s1309_s3 + $0x58] sm:$0xff]   ;;  %v957_v15 = vld [vmem:[%s1309_s3 + $0x60] sm:$0xff]   ;;  %v285_v27 = vsub.s32 0, %v284_v26  ;;  %v289_v29 = vsub.s32 1, %v284_v26 }
  0x5e   : > { %s1222_s27 = scalar_lea.vmem %s1306_s0, %s791_s23  ;;  %882 = vmatprep.subr.bf16.mxu1 %v951_v8  ;;  %v956_v14 = vld [vmem:[%s1309_s3 + $0x18] sm:$0xff]   ;;  %v958_v17 = vld [vmem:[%s1309_s3 + $0x20] sm:$0xff]   ;;  %v959_v18 = vld [vmem:[%s1309_s3 + $0x68] sm:$0xff]   ;;  %s1285_s14 = scalar_lea.vmem %s1311_s5, %s791_s23 }
  0x5f   : > { %v945_v5 = vld [vmem:[%s1222_s27] sm:$0xff]   ;;  %349 = vmatpush1.bf16.msra.mxu0 %v944_v4  ;;  %v946_v11 = vld [vmem:[%s1222_s27 + $0x8] sm:$0xff]   ;;  %v947_v16 = vld [vmem:[%s1222_s27 + $0x10] sm:$0xff]  }
  0x60   : > { %841 = vmatprep.subr.bf16.mxu0 %v949_v6  ;;  %v948_v19 = vld [vmem:[%s1222_s27 + $0x18] sm:$0xff]   ;;  %v960_v20 = vld [vmem:[%s1309_s3 + $0x28] sm:$0xff]   ;;  %v961_v21 = vld [vmem:[%s1309_s3 + $0x70] sm:$0xff]  }
  0x61   : > { %890 = vmatpush3.bf16.msra.mxu1 %v952_v9  ;;  %v962_v22 = vld [vmem:[%s1309_s3 + $0x30] sm:$0xff]   ;;  %v963_v23 = vld [vmem:[%s1309_s3 + $0x78] sm:$0xff]   ;;  %v281_v28 = vld [vmem:[#allocation4] sm:$0x3] }
  0x62   : > { %802 = vmatmul.mubr.msk.bf16.vlgmr.msra.gmra.mrb[0].mxu0 %vm333_vm0, %v945_v5  ;;  %883 = vmatprep.subr.bf16.mxu1 %v953_v10  ;;  %v964_v24 = vld [vmem:[%s1309_s3 + $0x38] sm:$0xff]   ;;  %v286_v30 = vrot.slane %v281_v28, %v285_v27  ;;  %v290_v31 = vrot.slane %v281_v28, %v289_v29  ;;  %v806_v25 = vld [vmem:[#allocation6] ss:$0 sm:$0xff] }
  0x63   : > { %388 = vmatprep.mubr.bf16.mxu0 %v1070_v0  ;;  %842 = vmatpush3.bf16.msra.mxu0 %v950_v7 }
  0x64   : > { %843 = vmatprep.subr.bf16.mxu0 %v951_v8 }
  0x65   : > { %891 = vmatpush3.bf16.msra.mxu1 %v954_v12 }
  0x66   : > { %884 = vmatprep.subr.bf16.mxu1 %v955_v13 }
  0x67   : > { %844 = vmatpush3.bf16.msra.mxu0 %v952_v9 }
  0x68   : > { %845 = vmatprep.subr.bf16.mxu0 %v953_v10 }
  0x69   : > { %892 = vmatpush3.bf16.msra.mxu1 %v956_v14 }
  0x6a   : > { %803 = vmatmul.mubr.msk.bf16.gmra.mrb[4].mxu0 %vm333_vm0, %v946_v11  ;;  %885 = vmatprep.subr.bf16.mxu1 %v957_v15 }
  0x6b   : > { %398 = vmatprep.mubr.bf16.mxu0 %v1070_v0  ;;  %846 = vmatpush3.bf16.msra.mxu0 %v954_v12 }
  0x6c   : > { %847 = vmatprep.subr.bf16.mxu0 %v955_v13 }
  0x6d   : > { %893 = vmatpush3.bf16.msra.mxu1 %v958_v17 }
  0x6e   : > { %886 = vmatprep.subr.bf16.mxu1 %v959_v18 }
  0x6f   : > { %848 = vmatpush3.bf16.msra.mxu0 %v956_v14 }
  0x70   : > { %849 = vmatprep.subr.bf16.mxu0 %v957_v15 }
  0x71   : > { %894 = vmatpush3.bf16.msra.mxu1 %v960_v20 }
  0x72   : > { %804 = vmatmul.mubr.msk.bf16.gmra.mrb[8].mxu0 %vm333_vm0, %v947_v16  ;;  %887 = vmatprep.subr.bf16.mxu1 %v961_v21 }
  0x73   : > { %408 = vmatprep.mubr.bf16.mxu0 %v1070_v0  ;;  %850 = vmatpush3.bf16.msra.mxu0 %v958_v17 }
  0x74   : > { %851 = vmatprep.subr.bf16.mxu0 %v959_v18 }
  0x75   : > { %895 = vmatpush3.bf16.msra.mxu1 %v962_v22 }
  0x76   : > { %888 = vmatprep.subr.bf16.mxu1 %v963_v23 }
  0x77   : > { %852 = vmatpush3.bf16.msra.mxu0 %v960_v20 }
  0x78   : > { %853 = vmatprep.subr.bf16.mxu0 %v961_v21 }
  0x79   : > { %896 = vmatpush3.bf16.msra.mxu1 %v964_v24 }
  0x7a   : > { %805 = vmatmul.mubr.msk.bf16.gmra.mrb[12].mxu0 %vm333_vm0, %v948_v19 }
  0x7b   : > { %854 = vmatpush3.bf16.msra.mxu0 %v962_v22 }
  0x7c   : > { %855 = vmatprep.subr.bf16.mxu0 %v963_v23 }
  0x7f   : > { %856 = vmatpush3.bf16.msra.mxu0 %v964_v24 }
 0x135   : > { %v380_v32 = vpop.f32.mrb[0].mxu0 }
 0x136   : > { %v381_v33 = vadd.f32 %v380_v32, %v286_v30  ;;  %v382_v34 = vpop.f32.mrb[1].mxu0 }
 0x137   : > { %v383_v35 = vadd.f32 %v382_v34, %v290_v31  ;;  %v384_v36 = vpop.f32.mrb[2].mxu0 }
 0x138   : > { %v385_v37 = vadd.f32 %v384_v36, %v286_v30  ;;  %v386_v38 = vpop.f32.mrb[3].mxu0  ;;  %v419_v40 = vmax.f32 %v381_v33, 0.0 }
 0x139   : > { %v387_v39 = vadd.f32 %v386_v38, %v290_v31  ;;  %v420_v42 = vmax.f32 %v383_v35, 0.0 }
 0x13a   : > { %v421_v41 = vmax.f32 %v385_v37, 0.0 }
 0x13b   : > { %v422_v43 = vmax.f32 %v387_v39, 0.0 }
 0x13c   : > { %v435_v44 = vpack.c.bf16 %v421_v41, %v419_v40 }
 0x13d   : > { %v436_v45 = vpack.c.bf16 %v422_v43, %v420_v42  ;;  %v390_v46 = vpop.f32.mrb[4].mxu0 }
 0x13e   : > { %v391_v47 = vadd.f32 %v390_v46, %v286_v30  ;;  %v392_v48 = vpop.f32.mrb[5].mxu0 }
 0x13f   : > { %v393_v49 = vadd.f32 %v392_v48, %v290_v31  ;;  %v394_v50 = vpop.f32.mrb[6].mxu0  ;;  %610 = vmatprep.mubr.bf16.mxu0 %v436_v45 }
 0x140   : > { %v395_v51 = vadd.f32 %v394_v50, %v286_v30  ;;  %v396_v52 = vpop.f32.mrb[7].mxu0  ;;  %611 = vmatmul.mubr.bf16.vlgmr.msra.gmra.mrb[16].mxu0 %v435_v44  ;;  %v423_v54 = vmax.f32 %v391_v47, 0.0 }
 0x141   : > { %v397_v53 = vadd.f32 %v396_v52, %v290_v31  ;;  %v424_v56 = vmax.f32 %v393_v49, 0.0 }
 0x142   : > { %v425_v55 = vmax.f32 %v395_v51, 0.0 }
 0x143   : > { %v426_v57 = vmax.f32 %v397_v53, 0.0 }
 0x144   : > { %v437_v58 = vpack.c.bf16 %v425_v55, %v423_v54 }
 0x145   : > { %v400_v59 = vpop.f32.mrb[8].mxu0  ;;  %v438_v60 = vpack.c.bf16 %v426_v57, %v424_v56 }
 0x146   : > { %v401_v61 = vadd.f32 %v400_v59, %v286_v30  ;;  %v402_v62 = vpop.f32.mrb[9].mxu0 }
 0x147   : > { %v403_v63 = vadd.f32 %v402_v62, %v290_v31  ;;  %v404_v0 = vpop.f32.mrb[10].mxu0  ;;  %618 = vmatprep.mubr.bf16.mxu1 %v438_v60 }
 0x148   : > { %v405_v1 = vadd.f32 %v404_v0, %v286_v30  ;;  %v406_v2 = vpop.f32.mrb[11].mxu0  ;;  %619 = vmatmul.mubr.bf16.vlgmr.msra.gmra.mrb[0].mxu1 %v437_v58  ;;  %v427_v4 = vmax.f32 %v401_v61, 0.0 }
 0x149   : > { %v407_v3 = vadd.f32 %v406_v2, %v290_v31  ;;  %v428_v6 = vmax.f32 %v403_v63, 0.0 }
 0x14a   : > { %v429_v5 = vmax.f32 %v405_v1, 0.0 }
 0x14b   : > { %v430_v7 = vmax.f32 %v407_v3, 0.0 }
 0x14c   : > { %v439_v8 = vpack.c.bf16 %v429_v5, %v427_v4 }
 0x14d   : > { %v440_v9 = vpack.c.bf16 %v430_v7, %v428_v6  ;;  %v410_v10 = vpop.f32.mrb[12].mxu0 }
 0x14e   : > { %v411_v11 = vadd.f32 %v410_v10, %v286_v30  ;;  %v412_v12 = vpop.f32.mrb[13].mxu0 }
 0x14f   : > { %v413_v13 = vadd.f32 %v412_v12, %v290_v31  ;;  %v414_v14 = vpop.f32.mrb[14].mxu0  ;;  %626 = vmatprep.mubr.bf16.mxu1 %v440_v9 }
 0x150   : > { %v415_v15 = vadd.f32 %v414_v14, %v286_v30  ;;  %v416_v16 = vpop.f32.mrb[15].mxu0  ;;  %627 = vmatmul.mubr.bf16.gmra.mrb[4].mxu1 %v439_v8  ;;  %v431_v18 = vmax.f32 %v411_v11, 0.0 }
 0x151   : > { %v417_v17 = vadd.f32 %v416_v16, %v290_v31  ;;  %v432_v20 = vmax.f32 %v413_v13, 0.0 }
 0x152   : > { %v433_v19 = vmax.f32 %v415_v15, 0.0 }
 0x153   : > { %v434_v21 = vmax.f32 %v417_v17, 0.0 }
 0x154   : > { %v441_v22 = vpack.c.bf16 %v433_v19, %v431_v18 }
 0x155   : > { %v442_v23 = vpack.c.bf16 %v434_v21, %v432_v20 }
 0x157   : > { %634 = vmatprep.mubr.bf16.mxu1 %v442_v23 }
 0x158   : > { %635 = vmatmul.mubr.bf16.gmra.mrb[8].mxu1 %v441_v22 }
 0x213   : > { %v857_v24 = vpop.f32.mrb[16].mxu0 }
 0x214   : > { %v858_v26 = vpop.f32.mrb[17].mxu0 }
 0x215   : > { %v859_v27 = vadd.f32 %v858_v26, %v857_v24  ;;  %v860_v28 = vpop.f32.mrb[18].mxu0 }
 0x216   : > { %v861_v29 = vpop.f32.mrb[19].mxu0 }
 0x217   : > { %v613_v32 = vadd.f32 %v859_v27, %v806_v25  ;;  %v862_v30 = vadd.f32 %v861_v29, %v860_v28 }
 0x219   : > { %v643_v33 = vmax.f32 %v613_v32, 0.0  ;;  %v616_v34 = vadd.f32 %v862_v30, %v806_v25 }
 0x21b   : > { %v833_v31 = vpack.c.bf16 %v643_v33, %v643_v33  ;;  %v644_v35 = vmax.f32 %v616_v34, 0.0  ;;  %v863_v36 = vpop.f32.mrb[0].mxu1 }
 0x21c   : > { %v864_v37 = vpop.f32.mrb[1].mxu1 }
 0x21d   : > { %684 = vst.msk [vmem:[%s1285_s14] sm:$0xf] %vm683_vm1, %v833_v31  ;;  %v834_v38 = vpack.c.bf16 %v644_v35, %v644_v35  ;;  %v865_v39 = vadd.f32 %v864_v37, %v863_v36  ;;  %v866_v40 = vpop.f32.mrb[2].mxu1 }
 0x21e   : > { %v867_v41 = vpop.f32.mrb[3].mxu1 }
 0x21f   : > { %685 = vst.msk [vmem:[%s1285_s14 + $0x4] sm:$0xf] %vm683_vm1, %v834_v38  ;;  %v621_v42 = vadd.f32 %v865_v39, %v806_v25  ;;  %v868_v43 = vadd.f32 %v867_v41, %v866_v40 }
 0x221   : > { %v645_v44 = vmax.f32 %v621_v42, 0.0  ;;  %v624_v45 = vadd.f32 %v868_v43, %v806_v25 }
 0x223   : > { %v835_v46 = vpack.c.bf16 %v645_v44, %v645_v44  ;;  %v646_v47 = vmax.f32 %v624_v45, 0.0  ;;  %v869_v48 = vpop.f32.mrb[4].mxu1 }
 0x224   : > { %v870_v49 = vpop.f32.mrb[5].mxu1 }
 0x225   : > { %686 = vst.msk [vmem:[%s1285_s14 + $0x8] sm:$0xf] %vm683_vm1, %v835_v46  ;;  %v836_v50 = vpack.c.bf16 %v646_v47, %v646_v47  ;;  %v871_v51 = vadd.f32 %v870_v49, %v869_v48  ;;  %v872_v52 = vpop.f32.mrb[6].mxu1 }
 0x226   : > { %v873_v53 = vpop.f32.mrb[7].mxu1 }
 0x227   : > { %687 = vst.msk [vmem:[%s1285_s14 + $0xc] sm:$0xf] %vm683_vm1, %v836_v50  ;;  %v629_v54 = vadd.f32 %v871_v51, %v806_v25  ;;  %v874_v55 = vadd.f32 %v873_v53, %v872_v52 }
 0x229   : > { %v647_v56 = vmax.f32 %v629_v54, 0.0  ;;  %v632_v57 = vadd.f32 %v874_v55, %v806_v25 }
 0x22b   : > { %v837_v58 = vpack.c.bf16 %v647_v56, %v647_v56  ;;  %v648_v59 = vmax.f32 %v632_v57, 0.0  ;;  %v875_v60 = vpop.f32.mrb[8].mxu1 }
 0x22c   : > { %v876_v61 = vpop.f32.mrb[9].mxu1 }
 0x22d   : > { %688 = vst.msk [vmem:[%s1285_s14 + $0x10] sm:$0xf] %vm683_vm1, %v837_v58  ;;  %v838_v62 = vpack.c.bf16 %v648_v59, %v648_v59  ;;  %v877_v63 = vadd.f32 %v876_v61, %v875_v60  ;;  %v878_v0 = vpop.f32.mrb[10].mxu1 }
 0x22e   : > { %v879_v1 = vpop.f32.mrb[11].mxu1 }
 0x22f   : > { %689 = vst.msk [vmem:[%s1285_s14 + $0x14] sm:$0xf] %vm683_vm1, %v838_v62  ;;  %v637_v2 = vadd.f32 %v877_v63, %v806_v25  ;;  %v880_v3 = vadd.f32 %v879_v1, %v878_v0 }
 0x231   : > { %v649_v4 = vmax.f32 %v637_v2, 0.0  ;;  %v640_v5 = vadd.f32 %v880_v3, %v806_v25 }
 0x233   : > { %v839_v6 = vpack.c.bf16 %v649_v4, %v649_v4  ;;  %v650_v7 = vmax.f32 %v640_v5, 0.0 }
 0x235   : > { %690 = vst.msk [vmem:[%s1285_s14 + $0x18] sm:$0xf] %vm683_vm1, %v839_v6  ;;  %v840_v8 = vpack.c.bf16 %v650_v7, %v650_v7 }
 0x237   : > { %691 = vst.msk [vmem:[%s1285_s14 + $0x1c] sm:$0xf] %vm683_vm1, %v840_v8 }
 0x238 PF: > { %s17_s18 = sadd.s32 1, %s1063_s18  }
 0x239   : > { %p14_p8 = scmp.ge.s32.totalorder %s17_s18, 4  }
 0x23b   :  { %16 = sbr.rel (!%p14_p8) target bundleno = 2 (0x2), region = 83 }
 0x242   :  { %714 = vsyncpa [#allocation3], 1 }
 0x243   :  { %716 = vsyncpa [#allocation3 + $0x1], 1 }
 0x244   :  { %717 = vsyncpa [#allocation5], 1 }

// kernel: feature_flat_forward.3
= control target key start
LH: loop header
LB: loop body
LE: loop exit
PB: predicated region body
PF: predicated region fallthrough
CT: control target
= control target key end

     0   :  { %v554_v28 = vlaneseq  ;;  %v3866_v36 = vmov 1966171168   ;;  %s4731_s0 = inlined_call_operand.vmem [shape: bf16[2,4096], index: 0, kind: input, shape index: {}]   ;;  %s4732_s1 = inlined_call_operand.vmem [shape: bf16[4096,32], index: 1, kind: input, shape index: {}]   ;;  %s4733_s2 = inlined_call_operand.vmem [shape: f32[1,32], index: 2, kind: input, shape index: {}]   ;;  %s4734_s3 = inlined_call_operand.hbm [shape: f32[2,32], index: 3, kind: output, shape index: {}]  }
   0x1   :  { %v3582_v0 = vld [vmem:[%s4732_s1 + $0x40] sm:$0xff]   ;;  %v3586_v4 = vld [vmem:[%s4732_s1 + $0x48] sm:$0xff]   ;;  %v3590_v8 = vld [vmem:[%s4732_s1 + $0x50] sm:$0xff]   ;;  %v552_v37 = vunpack.c.l.s4 %v3866_v36 }
   0x2   :  { %v3583_v1 = vld [vmem:[%s4732_s1 + $0xc0] sm:$0xff]   ;;  %3228 = vmatprep.subr.bf16.mxu0 %v3582_v0  ;;  %v3587_v5 = vld [vmem:[%s4732_s1 + $0xc8] sm:$0xff]   ;;  %v3591_v9 = vld [vmem:[%s4732_s1 + $0xd0] sm:$0xff]   ;;  %v555_v33 = vshrl.u32 %v554_v28, 7 }
   0x3   :  { %v3584_v2 = vld [vmem:[%s4732_s1] sm:$0xff]   ;;  %3250 = vmatprep.subr.bf16.mxu1 %v3583_v1  ;;  %v3588_v6 = vld [vmem:[%s4732_s1 + $0x8] sm:$0xff]   ;;  %v3592_v10 = vld [vmem:[%s4732_s1 + $0x10] sm:$0xff]   ;;  %v553_v40 = vunpack.c.0.s8 %v552_v37 }
   0x4   :  { %v3585_v3 = vld [vmem:[%s4732_s1 + $0x80] sm:$0xff]   ;;  %3229 = vmatpush3.bf16.msra.mxu0 %v3584_v2  ;;  %v3589_v7 = vld [vmem:[%s4732_s1 + $0x88] sm:$0xff]   ;;  %v3593_v11 = vld [vmem:[%s4732_s1 + $0x90] sm:$0xff]  }
   0x5   :  { %3251 = vmatpush3.bf16.msra.mxu1 %v3585_v3  ;;  %3230 = vmatprep.subr.bf16.mxu0 %v3586_v4  ;;  %v3594_v12 = vld [vmem:[%s4732_s1 + $0x58] sm:$0xff]   ;;  %v3598_v16 = vld [vmem:[%s4732_s1 + $0x60] sm:$0xff]   ;;  %v3602_v20 = vld [vmem:[%s4732_s1 + $0x68] sm:$0xff]   ;;  %v3993_v41 = vsub.s32 %v553_v40, %v555_v33 }
   0x6   :  { %3252 = vmatprep.subr.bf16.mxu1 %v3587_v5  ;;  %v3595_v13 = vld [vmem:[%s4732_s1 + $0xd8] sm:$0xff]   ;;  %v3599_v17 = vld [vmem:[%s4732_s1 + $0xe0] sm:$0xff]   ;;  %v3603_v21 = vld [vmem:[%s4732_s1 + $0xe8] sm:$0xff]  }
   0x7   :  { %v3596_v14 = vld [vmem:[%s4732_s1 + $0x18] sm:$0xff]   ;;  %v3600_v18 = vld [vmem:[%s4732_s1 + $0x20] sm:$0xff]   ;;  %v3604_v22 = vld [vmem:[%s4732_s1 + $0x28] sm:$0xff]  }
   0x8   :  { %3231 = vmatpush3.bf16.msra.mxu0 %v3588_v6  ;;  %v3597_v15 = vld [vmem:[%s4732_s1 + $0x98] sm:$0xff]   ;;  %v3601_v19 = vld [vmem:[%s4732_s1 + $0xa0] sm:$0xff]   ;;  %v3605_v23 = vld [vmem:[%s4732_s1 + $0xa8] sm:$0xff]  }
   0x9   :  { %3253 = vmatpush3.bf16.msra.mxu1 %v3589_v7  ;;  %3232 = vmatprep.subr.bf16.mxu0 %v3590_v8  ;;  %v3606_v24 = vld [vmem:[%s4732_s1 + $0x70] sm:$0xff]   ;;  %v3610_v29 = vld [vmem:[%s4732_s1 + $0x78] sm:$0xff]   ;;  %v30_v34 = vld [vmem:[%s4731_s0] sm:$0xff] }
   0xa   :  { %3254 = vmatprep.subr.bf16.mxu1 %v3591_v9  ;;  %v3607_v25 = vld [vmem:[%s4732_s1 + $0xf0] sm:$0xff]   ;;  %v3611_v30 = vld [vmem:[%s4732_s1 + $0xf8] sm:$0xff]   ;;  %v3615_v35 = vld [vmem:[%s4732_s1 + $0x140] sm:$0xff]   ;;  %v550_v39 = vcombine.high %v30_v34, %v30_v34  ;;  %v557_v42 = vrot.slane %v30_v34, %v3993_v41 }
   0xb   :  { %v3608_v26 = vld [vmem:[%s4732_s1 + $0x30] sm:$0xff]   ;;  %v3612_v31 = vld [vmem:[%s4732_s1 + $0x38] sm:$0xff]   ;;  %v3616_v38 = vld [vmem:[%s4732_s1 + $0x1c0] sm:$0xff]  }
   0xc   :  { %3233 = vmatpush3.bf16.msra.mxu0 %v3592_v10  ;;  %v3609_v27 = vld [vmem:[%s4732_s1 + $0xb0] sm:$0xff]   ;;  %v3613_v32 = vld [vmem:[%s4732_s1 + $0xb8] sm:$0xff]   ;;  %v3997_v43 = vrot.slane %v550_v39, %v3993_v41  ;;  %v565_v44 = vcombine.high %v557_v42, %v557_v42  ;;  %v573_v45 = vrot.slane %v557_v42, %v3993_v41  ;;  %v3617_v47 = vld [vmem:[%s4732_s1 + $0x100] sm:$0xff]  }
   0xd   :  { %3255 = vmatpush3.bf16.msra.mxu1 %v3593_v11  ;;  %3234 = vmatprep.subr.bf16.mxu0 %v3594_v12  ;;  %v3618_v49 = vld [vmem:[%s4732_s1 + $0x180] sm:$0xff]   ;;  %v3619_v52 = vld [vmem:[%s4732_s1 + $0x148] sm:$0xff]   ;;  %v3623_v58 = vld [vmem:[%s4732_s1 + $0x150] sm:$0xff]  }
   0xe   :  { %3256 = vmatprep.subr.bf16.mxu1 %v3595_v13  ;;  %v566_v46 = vcombine.high %v3997_v43, %v3997_v43  ;;  %v587_v48 = vrot.slane %v565_v44, %v3993_v41  ;;  %v595_v51 = vcombine.high %v573_v45, %v573_v45  ;;  %v3620_v54 = vld [vmem:[%s4732_s1 + $0x1c8] sm:$0xff]   ;;  %v3624_v59 = vld [vmem:[%s4732_s1 + $0x1d0] sm:$0xff]   ;;  %v3627_v62 = vld [vmem:[%s4732_s1 + $0x158] sm:$0xff]  }
   0xf   :  { %v3621_v55 = vld [vmem:[%s4732_s1 + $0x108] sm:$0xff]   ;;  %v3625_v60 = vld [vmem:[%s4732_s1 + $0x110] sm:$0xff]   ;;  %v3628_v63 = vld [vmem:[%s4732_s1 + $0x1d8] sm:$0xff]  }
  0x10   :  { %3235 = vmatpush3.bf16.msra.mxu0 %v3596_v14  ;;  %v594_v50 = vrot.slane %v566_v46, %v3993_v41  ;;  %2346 = vmatprep.mubr.bf16.mxu0 %v587_v48  ;;  %v597_v53 = vcombine.high %v587_v48, %v587_v48  ;;  %v3622_v57 = vld [vmem:[%s4732_s1 + $0x188] sm:$0xff]   ;;  %v3626_v61 = vld [vmem:[%s4732_s1 + $0x190] sm:$0xff]   ;;  %v3629_v0 = vld [vmem:[%s4732_s1 + $0x118] sm:$0xff]  }
  0x11   :  { %3257 = vmatpush3.bf16.msra.mxu1 %v3597_v15  ;;  %3236 = vmatprep.subr.bf16.mxu0 %v3598_v16  ;;  %v3630_v1 = vld [vmem:[%s4732_s1 + $0x198] sm:$0xff]   ;;  %v3631_v2 = vld [vmem:[%s4732_s1 + $0x160] sm:$0xff]   ;;  %v3635_v6 = vld [vmem:[%s4732_s1 + $0x168] sm:$0xff]  }
  0x12   :  { %3258 = vmatprep.subr.bf16.mxu1 %v3599_v17  ;;  %v598_v56 = vcombine.high %v594_v50, %v594_v50  ;;  %2386 = vmatprep.mubr.bf16.mxu1 %v597_v53  ;;  %v3632_v3 = vld [vmem:[%s4732_s1 + $0x1e0] sm:$0xff]   ;;  %v3636_v7 = vld [vmem:[%s4732_s1 + $0x1e8] sm:$0xff]   ;;  %v3639_v10 = vld [vmem:[%s4732_s1 + $0x170] sm:$0xff]  }
  0x13   :  { %v3633_v4 = vld [vmem:[%s4732_s1 + $0x120] sm:$0xff]   ;;  %v3637_v8 = vld [vmem:[%s4732_s1 + $0x128] sm:$0xff]   ;;  %v3640_v11 = vld [vmem:[%s4732_s1 + $0x1f0] sm:$0xff]  }
  0x14   :  { %3237 = vmatpush3.bf16.msra.mxu0 %v3600_v18  ;;  %v3634_v5 = vld [vmem:[%s4732_s1 + $0x1a0] sm:$0xff]   ;;  %v3638_v9 = vld [vmem:[%s4732_s1 + $0x1a8] sm:$0xff]   ;;  %v3641_v12 = vld [vmem:[%s4732_s1 + $0x130] sm:$0xff]   ;;  %v580_v18 = vrot.slane %v3997_v43, %v3993_v41 }
  0x15   :  { %3259 = vmatpush3.bf16.msra.mxu1 %v3601_v19  ;;  %3238 = vmatprep.subr.bf16.mxu0 %v3602_v20  ;;  %v3642_v13 = vld [vmem:[%s4732_s1 + $0x1b0] sm:$0xff]   ;;  %v3643_v14 = vld [vmem:[%s4732_s1 + $0x178] sm:$0xff]   ;;  %v3647_v19 = vld [vmem:[%s4732_s1 + $0x240] sm:$0xff]  }
  0x16   :  { %3260 = vmatprep.subr.bf16.mxu1 %v3603_v21  ;;  %v3644_v15 = vld [vmem:[%s4732_s1 + $0x1f8] sm:$0xff]   ;;  %v3648_v20 = vld [vmem:[%s4732_s1 + $0x2c0] sm:$0xff]   ;;  %v3655_v28 = vld [vmem:[%s4732_s1 + $0x250] sm:$0xff]  }
  0x17   :  { %v3645_v16 = vld [vmem:[%s4732_s1 + $0x138] sm:$0xff]   ;;  %v3649_v21 = vld [vmem:[%s4732_s1 + $0x200] sm:$0xff]   ;;  %v3667_v40 = vld [vmem:[%s4732_s1 + $0x268] sm:$0xff]  }
  0x18   :  { %3239 = vmatpush3.bf16.msra.mxu0 %v3604_v22  ;;  %v3646_v17 = vld [vmem:[%s4732_s1 + $0x1b8] sm:$0xff]   ;;  %v3650_v22 = vld [vmem:[%s4732_s1 + $0x280] sm:$0xff]   ;;  %v3668_v42 = vld [vmem:[%s4732_s1 + $0x2e8] sm:$0xff]  }
  0x19   :  { %3261 = vmatpush3.bf16.msra.mxu1 %v3605_v23  ;;  %3240 = vmatprep.subr.bf16.mxu0 %v3606_v24  ;;  %v596_v23 = vcombine.high %v580_v18, %v580_v18  ;;  %v3651_v24 = vld [vmem:[%s4732_s1 + $0x248] sm:$0xff]   ;;  %v3660_v33 = vld [vmem:[%s4732_s1 + $0x2d8] sm:$0xff]   ;;  %v3663_v36 = vld [vmem:[%s4732_s1 + $0x260] sm:$0xff]  }
  0x1a   :  { %3262 = vmatprep.subr.bf16.mxu1 %v3607_v25  ;;  %v3652_v25 = vld [vmem:[%s4732_s1 + $0x2c8] sm:$0xff]   ;;  %v3661_v34 = vld [vmem:[%s4732_s1 + $0x218] sm:$0xff]   ;;  %v3664_v37 = vld [vmem:[%s4732_s1 + $0x2e0] sm:$0xff]  }
  0x1b   :  { %v3666_v39 = vld [vmem:[%s4732_s1 + $0x2a0] sm:$0xff]   ;;  %v3669_v43 = vld [vmem:[%s4732_s1 + $0x228] sm:$0xff]  }
  0x1c   :  { %3241 = vmatpush3.bf16.msra.mxu0 %v3608_v26  ;;  %v3653_v26 = vld [vmem:[%s4732_s1 + $0x208] sm:$0xff]  }
  0x1d   :  { %3263 = vmatpush3.bf16.msra.mxu1 %v3609_v27  ;;  %3242 = vmatprep.subr.bf16.mxu0 %v3610_v29  ;;  %v3654_v27 = vld [vmem:[%s4732_s1 + $0x288] sm:$0xff]   ;;  %v3656_v29 = vld [vmem:[%s4732_s1 + $0x2d0] sm:$0xff]  }
  0x1e   :  { %3264 = vmatprep.subr.bf16.mxu1 %v3611_v30  ;;  %v3657_v30 = vld [vmem:[%s4732_s1 + $0x210] sm:$0xff]   ;;  %v3670_v44 = vld [vmem:[%s4732_s1 + $0x2a8] sm:$0xff]  }
  0x1f   :  { %v31_v46 = vld [vmem:[%s4731_s0 + $0x8] sm:$0xff] }
  0x20   :  { %3243 = vmatpush3.bf16.msra.mxu0 %v3612_v31  ;;  %v3658_v31 = vld [vmem:[%s4732_s1 + $0x290] sm:$0xff]   ;;  %v606_v48 = vrot.slane %v31_v46, %v3993_v41 }
  0x21   :  { %3265 = vmatpush3.bf16.msra.mxu1 %v3613_v32  ;;  %3272 = vmatprep.subr.bf16.mxu0 %v3615_v35  ;;  %v3659_v32 = vld [vmem:[%s4732_s1 + $0x258] sm:$0xff]  }
  0x22   :  { %3294 = vmatprep.subr.bf16.mxu1 %v3616_v38  ;;  %v3662_v35 = vld [vmem:[%s4732_s1 + $0x298] sm:$0xff]   ;;  %v3665_v38 = vld [vmem:[%s4732_s1 + $0x220] sm:$0xff]  }
  0x23   :  { %2347 = vmatmul.mubr.bf16.vlgmr.msra.gmra.mrb[0].mxu0 %v573_v45  ;;  %v3671_v45 = vld [vmem:[%s4732_s1 + $0x270] sm:$0xff]  }
  0x24   :  { %3273 = vmatpush3.bf16.msra.mxu0 %v3617_v47  ;;  %2387 = vmatmul.mubr.bf16.vlgmr.msra.gmra.mrb[0].mxu1 %v595_v51  ;;  %v3672_v47 = vld [vmem:[%s4732_s1 + $0x2f0] sm:$0xff]  }
  0x25   :  { %3274 = vmatprep.subr.bf16.mxu0 %v3619_v52  ;;  %3295 = vmatpush3.bf16.msra.mxu1 %v3618_v49  ;;  %v599_v49 = vcombine.high %v31_v46, %v31_v46  ;;  %v3674_v51 = vld [vmem:[%s4732_s1 + $0x2b0] sm:$0xff]   ;;  %v614_v52 = vcombine.high %v606_v48, %v606_v48 }
  0x26   :  { %2426 = vmatprep.mubr.bf16.mxu0 %v594_v50  ;;  %3296 = vmatprep.subr.bf16.mxu1 %v3620_v54  ;;  %v3673_v50 = vld [vmem:[%s4732_s1 + $0x230] sm:$0xff]   ;;  %v3675_v54 = vld [vmem:[%s4732_s1 + $0x278] sm:$0xff]  }
  0x27   :  { %2466 = vmatprep.mubr.bf16.mxu1 %v598_v56  ;;  %v4185_v53 = vrot.slane %v599_v49, %v3993_v41  ;;  %v636_v56 = vrot.slane %v614_v52, %v3993_v41  ;;  %v3722_v46 = vld [vmem:[%s4732_s1 + $0x410] sm:$0xff]   ;;  %v3725_v49 = vld [vmem:[%s4732_s1 + $0x4d8] sm:$0xff]   ;;  %v3728_v52 = vld [vmem:[%s4732_s1 + $0x460] sm:$0xff]  }
  0x28   :  { %3275 = vmatpush3.bf16.msra.mxu0 %v3621_v55  ;;  %v3676_v55 = vld [vmem:[%s4732_s1 + $0x2f8] sm:$0xff]  }
  0x29   :  { %3276 = vmatprep.subr.bf16.mxu0 %v3623_v58  ;;  %3297 = vmatpush3.bf16.msra.mxu1 %v3622_v57  ;;  %v615_v57 = vcombine.high %v4185_v53, %v4185_v53  ;;  %v3677_v58 = vld [vmem:[%s4732_s1 + $0x238] sm:$0xff]  }
  0x2a   :  { %3298 = vmatprep.subr.bf16.mxu1 %v3624_v59  ;;  %v3678_v59 = vld [vmem:[%s4732_s1 + $0x2b8] sm:$0xff]  }
  0x2c   :  { %3277 = vmatpush3.bf16.msra.mxu0 %v3625_v60  ;;  %v646_v60 = vcombine.high %v636_v56, %v636_v56 }
  0x2d   :  { %3278 = vmatprep.subr.bf16.mxu0 %v3627_v62  ;;  %3299 = vmatpush3.bf16.msra.mxu1 %v3626_v61  ;;  %v622_v61 = vrot.slane %v606_v48, %v3993_v41  ;;  %v3679_v62 = vld [vmem:[%s4732_s1 + $0x340] sm:$0xff]   ;;  %v3724_v48 = vld [vmem:[%s4732_s1 + $0x458] sm:$0xff]  }
  0x2e   :  { %3300 = vmatprep.subr.bf16.mxu1 %v3628_v63  ;;  %v3680_v63 = vld [vmem:[%s4732_s1 + $0x3c0] sm:$0xff]  }
  0x30   :  { %3279 = vmatpush3.bf16.msra.mxu0 %v3629_v0  ;;  %v643_v0 = vrot.slane %v615_v57, %v3993_v41  ;;  %v3733_v57 = vld [vmem:[%s4732_s1 + $0x4e8] sm:$0xff]  }
  0x31   :  { %3280 = vmatprep.subr.bf16.mxu0 %v3631_v2  ;;  %3301 = vmatpush3.bf16.msra.mxu1 %v3630_v1  ;;  %v3681_v1 = vld [vmem:[%s4732_s1 + $0x300] sm:$0xff]  }
  0x32   :  { %3302 = vmatprep.subr.bf16.mxu1 %v3632_v3  ;;  %v3682_v2 = vld [vmem:[%s4732_s1 + $0x380] sm:$0xff]   ;;  %v644_v3 = vcombine.high %v622_v61, %v622_v61 }
  0x34   :  { %3281 = vmatpush3.bf16.msra.mxu0 %v3633_v4  ;;  %v3683_v4 = vld [vmem:[%s4732_s1 + $0x348] sm:$0xff]  }
  0x35   :  { %3282 = vmatprep.subr.bf16.mxu0 %v3635_v6  ;;  %3303 = vmatpush3.bf16.msra.mxu1 %v3634_v5  ;;  %v3684_v5 = vld [vmem:[%s4732_s1 + $0x3c8] sm:$0xff]   ;;  %v647_v6 = vcombine.high %v643_v0, %v643_v0 }
  0x36   :  { %3304 = vmatprep.subr.bf16.mxu1 %v3636_v7  ;;  %v3685_v7 = vld [vmem:[%s4732_s1 + $0x308] sm:$0xff]  }
  0x38   :  { %3283 = vmatpush3.bf16.msra.mxu0 %v3637_v8  ;;  %v3686_v8 = vld [vmem:[%s4732_s1 + $0x388] sm:$0xff]  }
  0x39   :  { %3284 = vmatprep.subr.bf16.mxu0 %v3639_v10  ;;  %3305 = vmatpush3.bf16.msra.mxu1 %v3638_v9  ;;  %v3687_v9 = vld [vmem:[%s4732_s1 + $0x350] sm:$0xff]  }
  0x3a   :  { %3306 = vmatprep.subr.bf16.mxu1 %v3640_v11  ;;  %v3688_v10 = vld [vmem:[%s4732_s1 + $0x3d0] sm:$0xff]  }
  0x3b   :  { %v3689_v11 = vld [vmem:[%s4732_s1 + $0x310] sm:$0xff]  }
  0x3c   :  { %3285 = vmatpush3.bf16.msra.mxu0 %v3641_v12  ;;  %v3690_v12 = vld [vmem:[%s4732_s1 + $0x390] sm:$0xff]  }
  0x3d   :  { %3286 = vmatprep.subr.bf16.mxu0 %v3643_v14  ;;  %3307 = vmatpush3.bf16.msra.mxu1 %v3642_v13  ;;  %v3691_v13 = vld [vmem:[%s4732_s1 + $0x358] sm:$0xff]  }
  0x3e   :  { %3308 = vmatprep.subr.bf16.mxu1 %v3644_v15  ;;  %v3692_v14 = vld [vmem:[%s4732_s1 + $0x3d8] sm:$0xff]  }
  0x3f   :  { %v3693_v15 = vld [vmem:[%s4732_s1 + $0x318] sm:$0xff]  }
  0x40   :  { %3287 = vmatpush3.bf16.msra.mxu0 %v3645_v16  ;;  %v3694_v16 = vld [vmem:[%s4732_s1 + $0x398] sm:$0xff]  }
  0x41   :  { %3316 = vmatprep.subr.bf16.mxu0 %v3647_v19  ;;  %3309 = vmatpush3.bf16.msra.mxu1 %v3646_v17  ;;  %v3695_v17 = vld [vmem:[%s4732_s1 + $0x360] sm:$0xff]  }
  0x42   :  { %3338 = vmatprep.subr.bf16.mxu1 %v3648_v20  ;;  %v3697_v19 = vld [vmem:[%s4732_s1 + $0x320] sm:$0xff]  }
  0x43   :  { %2427 = vmatmul.mubr.bf16.vlgmr.msra.gmra.mrb[4].mxu0 %v580_v18  ;;  %v3696_v18 = vld [vmem:[%s4732_s1 + $0x3e0] sm:$0xff]  }
  0x44   :  { %3317 = vmatpush3.bf16.msra.mxu0 %v3649_v21  ;;  %2467 = vmatmul.mubr.bf16.vlgmr.msra.gmra.mrb[4].mxu1 %v596_v23  ;;  %v3698_v20 = vld [vmem:[%s4732_s1 + $0x3a0] sm:$0xff]   ;;  %v3699_v21 = vld [vmem:[%s4732_s1 + $0x368] sm:$0xff]  }
  0x45   :  { %3318 = vmatprep.subr.bf16.mxu0 %v3651_v24  ;;  %3339 = vmatpush3.bf16.msra.mxu1 %v3650_v22  ;;  %v3700_v22 = vld [vmem:[%s4732_s1 + $0x3e8] sm:$0xff]  }
  0x46   :  { %3340 = vmatprep.subr.bf16.mxu1 %v3652_v25  ;;  %2506 = vmatprep.mubr.bf16.mxu0 %v636_v56  ;;  %v3701_v23 = vld [vmem:[%s4732_s1 + $0x328] sm:$0xff]   ;;  %v3703_v25 = vld [vmem:[%s4732_s1 + $0x370] sm:$0xff]  }
  0x47   :  { %2546 = vmatprep.mubr.bf16.mxu1 %v646_v60  ;;  %v3702_v24 = vld [vmem:[%s4732_s1 + $0x3a8] sm:$0xff]   ;;  %v3736_v60 = vld [vmem:[%s4732_s1 + $0x470] sm:$0xff]  }
  0x48   :  { %3319 = vmatpush3.bf16.msra.mxu0 %v3653_v26  ;;  %v3704_v26 = vld [vmem:[%s4732_s1 + $0x3f0] sm:$0xff]   ;;  %v3732_v56 = vld [vmem:[%s4732_s1 + $0x468] sm:$0xff]  }
  0x49   :  { %3320 = vmatprep.subr.bf16.mxu0 %v3655_v28  ;;  %3341 = vmatpush3.bf16.msra.mxu1 %v3654_v27  ;;  %v3705_v27 = vld [vmem:[%s4732_s1 + $0x330] sm:$0xff]  }
  0x4a   :  { %3342 = vmatprep.subr.bf16.mxu1 %v3656_v29  ;;  %v3706_v28 = vld [vmem:[%s4732_s1 + $0x3b0] sm:$0xff]   ;;  %v3707_v29 = vld [vmem:[%s4732_s1 + $0x378] sm:$0xff]  }
  0x4c   :  { %3321 = vmatpush3.bf16.msra.mxu0 %v3657_v30  ;;  %v3708_v30 = vld [vmem:[%s4732_s1 + $0x3f8] sm:$0xff]  }
  0x4d   :  { %3322 = vmatprep.subr.bf16.mxu0 %v3659_v32  ;;  %3343 = vmatpush3.bf16.msra.mxu1 %v3658_v31  ;;  %v3709_v31 = vld [vmem:[%s4732_s1 + $0x338] sm:$0xff]  }
  0x4e   :  { %3344 = vmatprep.subr.bf16.mxu1 %v3660_v33  ;;  %v3710_v32 = vld [vmem:[%s4732_s1 + $0x3b8] sm:$0xff]   ;;  %v629_v33 = vrot.slane %v4185_v53, %v3993_v41  ;;  %v3729_v53 = vld [vmem:[%s4732_s1 + $0x4e0] sm:$0xff]  }
  0x50   :  { %3323 = vmatpush3.bf16.msra.mxu0 %v3661_v34  ;;  %v3712_v34 = vld [vmem:[%s4732_s1 + $0x440] sm:$0xff]  }
  0x51   :  { %3324 = vmatprep.subr.bf16.mxu0 %v3663_v36  ;;  %3345 = vmatpush3.bf16.msra.mxu1 %v3662_v35  ;;  %v3713_v35 = vld [vmem:[%s4732_s1 + $0x4c0] sm:$0xff]  }
  0x52   :  { %3346 = vmatprep.subr.bf16.mxu1 %v3664_v37  ;;  %v3714_v36 = vld [vmem:[%s4732_s1 + $0x400] sm:$0xff]  }
  0x53   :  { %v3715_v37 = vld [vmem:[%s4732_s1 + $0x480] sm:$0xff]  }
  0x54   :  { %3325 = vmatpush3.bf16.msra.mxu0 %v3665_v38  ;;  %v645_v38 = vcombine.high %v629_v33, %v629_v33 }
  0x55   :  { %3326 = vmatprep.subr.bf16.mxu0 %v3667_v40  ;;  %3347 = vmatpush3.bf16.msra.mxu1 %v3666_v39  ;;  %v3716_v39 = vld [vmem:[%s4732_s1 + $0x448] sm:$0xff]  }
  0x56   :  { %3348 = vmatprep.subr.bf16.mxu1 %v3668_v42  ;;  %v3717_v40 = vld [vmem:[%s4732_s1 + $0x4c8] sm:$0xff]  }
  0x57   :  { %v3718_v42 = vld [vmem:[%s4732_s1 + $0x408] sm:$0xff]  }
  0x58   :  { %3327 = vmatpush3.bf16.msra.mxu0 %v3669_v43  ;;  %v3719_v43 = vld [vmem:[%s4732_s1 + $0x488] sm:$0xff]  }
  0x59   :  { %3328 = vmatprep.subr.bf16.mxu0 %v3671_v45  ;;  %3349 = vmatpush3.bf16.msra.mxu1 %v3670_v44  ;;  %v3720_v44 = vld [vmem:[%s4732_s1 + $0x450] sm:$0xff]  }
  0x5a   :  { %3350 = vmatprep.subr.bf16.mxu1 %v3672_v47  ;;  %v3721_v45 = vld [vmem:[%s4732_s1 + $0x4d0] sm:$0xff]  }
  0x5b   :  { %v3723_v47 = vld [vmem:[%s4732_s1 + $0x490] sm:$0xff]  }
  0x5c   :  { %3329 = vmatpush3.bf16.msra.mxu0 %v3673_v50  ;;  %v3726_v50 = vld [vmem:[%s4732_s1 + $0x418] sm:$0xff]  }
  0x5d   :  { %3330 = vmatprep.subr.bf16.mxu0 %v3675_v54  ;;  %3351 = vmatpush3.bf16.msra.mxu1 %v3674_v51  ;;  %v3727_v51 = vld [vmem:[%s4732_s1 + $0x498] sm:$0xff]   ;;  %v3730_v54 = vld [vmem:[%s4732_s1 + $0x420] sm:$0xff]  }
  0x5e   :  { %3352 = vmatprep.subr.bf16.mxu1 %v3676_v55  ;;  %v3731_v55 = vld [vmem:[%s4732_s1 + $0x4a0] sm:$0xff]  }
  0x60   :  { %3331 = vmatpush3.bf16.msra.mxu0 %v3677_v58  ;;  %v3734_v58 = vld [vmem:[%s4732_s1 + $0x428] sm:$0xff]  }
  0x61   :  { %3360 = vmatprep.subr.bf16.mxu0 %v3679_v62  ;;  %3353 = vmatpush3.bf16.msra.mxu1 %v3678_v59  ;;  %v3735_v59 = vld [vmem:[%s4732_s1 + $0x4a8] sm:$0xff]   ;;  %v3737_v62 = vld [vmem:[%s4732_s1 + $0x4f0] sm:$0xff]  }
  0x62   :  { %3382 = vmatprep.subr.bf16.mxu1 %v3680_v63 }
  0x63   :  { %2507 = vmatmul.mubr.bf16.vlgmr.msra.gmra.mrb[8].mxu0 %v622_v61  ;;  %v32_v61 = vld [vmem:[%s4731_s0 + $0x10] sm:$0xff] }
  0x64   :  { %3361 = vmatpush3.bf16.msra.mxu0 %v3681_v1  ;;  %2586 = vmatprep.mubr.bf16.mxu0 %v643_v0  ;;  %v655_v63 = vrot.slane %v32_v61, %v3993_v41  ;;  %v648_v0 = vcombine.high %v32_v61, %v32_v61  ;;  %v3738_v1 = vld [vmem:[%s4732_s1 + $0x430] sm:$0xff]  }
  0x65   :  { %2547 = vmatmul.mubr.bf16.vlgmr.msra.gmra.mrb[8].mxu1 %v644_v3  ;;  %3362 = vmatprep.subr.bf16.mxu0 %v3683_v4  ;;  %v3787_v61 = vld [vmem:[%s4732_s1 + $0x610] sm:$0xff]  }
  0x66   :  { %3383 = vmatpush3.bf16.msra.mxu1 %v3682_v2  ;;  %2626 = vmatprep.mubr.bf16.mxu1 %v647_v6  ;;  %v3739_v2 = vld [vmem:[%s4732_s1 + $0x4b0] sm:$0xff]   ;;  %v663_v3 = vcombine.high %v655_v63, %v655_v63  ;;  %v4391_v4 = vrot.slane %v648_v0, %v3993_v41  ;;  %v3741_v6 = vld [vmem:[%s4732_s1 + $0x4f8] sm:$0xff]  }
  0x67   :  { %3384 = vmatprep.subr.bf16.mxu1 %v3684_v5  ;;  %v3740_v5 = vld [vmem:[%s4732_s1 + $0x478] sm:$0xff]  }
  0x68   :  { %3363 = vmatpush3.bf16.msra.mxu0 %v3685_v7  ;;  %v685_v7 = vrot.slane %v663_v3, %v3993_v41  ;;  %v3790_v0 = vld [vmem:[%s4732_s1 + $0x6d8] sm:$0xff]   ;;  %v3793_v3 = vld [vmem:[%s4732_s1 + $0x660] sm:$0xff]  }
  0x69   :  { %3364 = vmatprep.subr.bf16.mxu0 %v3687_v9  ;;  %v3742_v9 = vld [vmem:[%s4732_s1 + $0x438] sm:$0xff]  }
  0x6a   :  { %3385 = vmatpush3.bf16.msra.mxu1 %v3686_v8  ;;  %v664_v8 = vcombine.high %v4391_v4, %v4391_v4 }
  0x6b   :  { %3386 = vmatprep.subr.bf16.mxu1 %v3688_v10  ;;  %v3743_v10 = vld [vmem:[%s4732_s1 + $0x4b8] sm:$0xff]  }
  0x6c   :  { %3365 = vmatpush3.bf16.msra.mxu0 %v3689_v11  ;;  %v695_v11 = vcombine.high %v685_v7, %v685_v7 }
  0x6d   :  { %3366 = vmatprep.subr.bf16.mxu0 %v3691_v13  ;;  %v3744_v13 = vld [vmem:[%s4732_s1 + $0x540] sm:$0xff]  }
  0x6e   :  { %3387 = vmatpush3.bf16.msra.mxu1 %v3690_v12  ;;  %v671_v12 = vrot.slane %v655_v63, %v3993_v41  ;;  %v3789_v63 = vld [vmem:[%s4732_s1 + $0x658] sm:$0xff]  }
  0x6f   :  { %3388 = vmatprep.subr.bf16.mxu1 %v3692_v14  ;;  %v3745_v14 = vld [vmem:[%s4732_s1 + $0x5c0] sm:$0xff]  }
  0x70   :  { %3367 = vmatpush3.bf16.msra.mxu0 %v3693_v15  ;;  %v692_v15 = vrot.slane %v664_v8, %v3993_v41  ;;  %v3798_v8 = vld [vmem:[%s4732_s1 + $0x6e8] sm:$0xff]  }
  0x71   :  { %3368 = vmatprep.subr.bf16.mxu0 %v3695_v17  ;;  %v3747_v17 = vld [vmem:[%s4732_s1 + $0x580] sm:$0xff]  }
  0x72   :  { %3389 = vmatpush3.bf16.msra.mxu1 %v3694_v16  ;;  %v3746_v16 = vld [vmem:[%s4732_s1 + $0x500] sm:$0xff]  }
  0x73   :  { %3390 = vmatprep.subr.bf16.mxu1 %v3696_v18  ;;  %v693_v18 = vcombine.high %v671_v12, %v671_v12 }
  0x74   :  { %3369 = vmatpush3.bf16.msra.mxu0 %v3697_v19  ;;  %v3748_v19 = vld [vmem:[%s4732_s1 + $0x548] sm:$0xff]  }
  0x75   :  { %3370 = vmatprep.subr.bf16.mxu0 %v3699_v21  ;;  %v696_v21 = vcombine.high %v692_v15, %v692_v15 }
  0x76   :  { %3391 = vmatpush3.bf16.msra.mxu1 %v3698_v20  ;;  %v3749_v20 = vld [vmem:[%s4732_s1 + $0x5c8] sm:$0xff]  }
  0x77   :  { %3392 = vmatprep.subr.bf16.mxu1 %v3700_v22  ;;  %v3750_v22 = vld [vmem:[%s4732_s1 + $0x508] sm:$0xff]  }
  0x78   :  { %3371 = vmatpush3.bf16.msra.mxu0 %v3701_v23  ;;  %v3751_v23 = vld [vmem:[%s4732_s1 + $0x588] sm:$0xff]  }
  0x79   :  { %3372 = vmatprep.subr.bf16.mxu0 %v3703_v25  ;;  %v3753_v25 = vld [vmem:[%s4732_s1 + $0x5d0] sm:$0xff]  }
  0x7a   :  { %3393 = vmatpush3.bf16.msra.mxu1 %v3702_v24  ;;  %v3752_v24 = vld [vmem:[%s4732_s1 + $0x550] sm:$0xff]  }
  0x7b   :  { %3394 = vmatprep.subr.bf16.mxu1 %v3704_v26  ;;  %v3754_v26 = vld [vmem:[%s4732_s1 + $0x510] sm:$0xff]  }
  0x7c   :  { %3373 = vmatpush3.bf16.msra.mxu0 %v3705_v27  ;;  %v3755_v27 = vld [vmem:[%s4732_s1 + $0x590] sm:$0xff]  }
  0x7d   :  { %3374 = vmatprep.subr.bf16.mxu0 %v3707_v29  ;;  %v3757_v29 = vld [vmem:[%s4732_s1 + $0x5d8] sm:$0xff]  }
  0x7e   :  { %3395 = vmatpush3.bf16.msra.mxu1 %v3706_v28  ;;  %v3756_v28 = vld [vmem:[%s4732_s1 + $0x558] sm:$0xff]  }
  0x7f   :  { %3396 = vmatprep.subr.bf16.mxu1 %v3708_v30  ;;  %v3758_v30 = vld [vmem:[%s4732_s1 + $0x518] sm:$0xff]  }
  0x80   :  { %3375 = vmatpush3.bf16.msra.mxu0 %v3709_v31  ;;  %v3759_v31 = vld [vmem:[%s4732_s1 + $0x598] sm:$0xff]  }
  0x81   :  { %3404 = vmatprep.subr.bf16.mxu0 %v3712_v34  ;;  %v3762_v34 = vld [vmem:[%s4732_s1 + $0x520] sm:$0xff]  }
  0x82   :  { %3397 = vmatpush3.bf16.msra.mxu1 %v3710_v32  ;;  %v3760_v32 = vld [vmem:[%s4732_s1 + $0x560] sm:$0xff]  }
  0x83   :  { %2587 = vmatmul.mubr.bf16.vlgmr.msra.gmra.mrb[12].mxu0 %v629_v33  ;;  %3426 = vmatprep.subr.bf16.mxu1 %v3713_v35  ;;  %v3761_v33 = vld [vmem:[%s4732_s1 + $0x5e0] sm:$0xff]  }
  0x84   :  { %3405 = vmatpush3.bf16.msra.mxu0 %v3714_v36  ;;  %2666 = vmatprep.mubr.bf16.mxu0 %v685_v7  ;;  %v3763_v35 = vld [vmem:[%s4732_s1 + $0x5a0] sm:$0xff]   ;;  %v3764_v36 = vld [vmem:[%s4732_s1 + $0x568] sm:$0xff]  }
  0x85   :  { %2627 = vmatmul.mubr.bf16.vlgmr.msra.gmra.mrb[12].mxu1 %v645_v38  ;;  %3406 = vmatprep.subr.bf16.mxu0 %v3716_v39  ;;  %v3766_v38 = vld [vmem:[%s4732_s1 + $0x528] sm:$0xff]  }
  0x86   :  { %3427 = vmatpush3.bf16.msra.mxu1 %v3715_v37  ;;  %2706 = vmatprep.mubr.bf16.mxu1 %v695_v11  ;;  %v3765_v37 = vld [vmem:[%s4732_s1 + $0x5e8] sm:$0xff]   ;;  %v3801_v11 = vld [vmem:[%s4732_s1 + $0x670] sm:$0xff]  }
  0x87   :  { %3428 = vmatprep.subr.bf16.mxu1 %v3717_v40  ;;  %v3767_v39 = vld [vmem:[%s4732_s1 + $0x5a8] sm:$0xff]   ;;  %v3768_v40 = vld [vmem:[%s4732_s1 + $0x570] sm:$0xff]  }
  0x88   :  { %3407 = vmatpush3.bf16.msra.mxu0 %v3718_v42  ;;  %v3769_v42 = vld [vmem:[%s4732_s1 + $0x5f0] sm:$0xff]   ;;  %v3797_v7 = vld [vmem:[%s4732_s1 + $0x668] sm:$0xff]  }
  0x89   :  { %3408 = vmatprep.subr.bf16.mxu0 %v3720_v44  ;;  %v3771_v44 = vld [vmem:[%s4732_s1 + $0x5b0] sm:$0xff]  }
  0x8a   :  { %3429 = vmatpush3.bf16.msra.mxu1 %v3719_v43  ;;  %v3770_v43 = vld [vmem:[%s4732_s1 + $0x530] sm:$0xff]  }
  0x8b   :  { %3430 = vmatprep.subr.bf16.mxu1 %v3721_v45  ;;  %v3772_v45 = vld [vmem:[%s4732_s1 + $0x578] sm:$0xff]  }
  0x8c   :  { %3409 = vmatpush3.bf16.msra.mxu0 %v3722_v46  ;;  %v3773_v46 = vld [vmem:[%s4732_s1 + $0x5f8] sm:$0xff]  }
  0x8d   :  { %3410 = vmatprep.subr.bf16.mxu0 %v3724_v48  ;;  %v3775_v48 = vld [vmem:[%s4732_s1 + $0x5b8] sm:$0xff]  }
  0x8e   :  { %3431 = vmatpush3.bf16.msra.mxu1 %v3723_v47  ;;  %v3774_v47 = vld [vmem:[%s4732_s1 + $0x538] sm:$0xff]  }
  0x8f   :  { %3432 = vmatprep.subr.bf16.mxu1 %v3725_v49  ;;  %v678_v49 = vrot.slane %v4391_v4, %v3993_v41  ;;  %v3794_v4 = vld [vmem:[%s4732_s1 + $0x6e0] sm:$0xff]  }
  0x90   :  { %3411 = vmatpush3.bf16.msra.mxu0 %v3726_v50  ;;  %v3777_v50 = vld [vmem:[%s4732_s1 + $0x640] sm:$0xff]  }
  0x91   :  { %3412 = vmatprep.subr.bf16.mxu0 %v3728_v52  ;;  %v3779_v52 = vld [vmem:[%s4732_s1 + $0x600] sm:$0xff]  }
  0x92   :  { %3433 = vmatpush3.bf16.msra.mxu1 %v3727_v51  ;;  %v3778_v51 = vld [vmem:[%s4732_s1 + $0x6c0] sm:$0xff]  }
  0x93   :  { %3434 = vmatprep.subr.bf16.mxu1 %v3729_v53  ;;  %v3780_v53 = vld [vmem:[%s4732_s1 + $0x680] sm:$0xff]  }
  0x94   :  { %3413 = vmatpush3.bf16.msra.mxu0 %v3730_v54  ;;  %v694_v54 = vcombine.high %v678_v49, %v678_v49 }
  0x95   :  { %3414 = vmatprep.subr.bf16.mxu0 %v3732_v56  ;;  %v3782_v56 = vld [vmem:[%s4732_s1 + $0x6c8] sm:$0xff]  }
  0x96   :  { %3435 = vmatpush3.bf16.msra.mxu1 %v3731_v55  ;;  %v3781_v55 = vld [vmem:[%s4732_s1 + $0x648] sm:$0xff]  }
  0x97   :  { %3436 = vmatprep.subr.bf16.mxu1 %v3733_v57  ;;  %v3783_v57 = vld [vmem:[%s4732_s1 + $0x608] sm:$0xff]  }
  0x98   :  { %3415 = vmatpush3.bf16.msra.mxu0 %v3734_v58  ;;  %v3784_v58 = vld [vmem:[%s4732_s1 + $0x688] sm:$0xff]  }
  0x99   :  { %3416 = vmatprep.subr.bf16.mxu0 %v3736_v60  ;;  %v3786_v60 = vld [vmem:[%s4732_s1 + $0x6d0] sm:$0xff]  }
  0x9a   :  { %3437 = vmatpush3.bf16.msra.mxu1 %v3735_v59  ;;  %v3785_v59 = vld [vmem:[%s4732_s1 + $0x650] sm:$0xff]  }
  0x9b   :  { %3438 = vmatprep.subr.bf16.mxu1 %v3737_v62  ;;  %v3788_v62 = vld [vmem:[%s4732_s1 + $0x690] sm:$0xff]  }
  0x9c   :  { %3417 = vmatpush3.bf16.msra.mxu0 %v3738_v1  ;;  %v3791_v1 = vld [vmem:[%s4732_s1 + $0x618] sm:$0xff]  }
  0x9d   :  { %3418 = vmatprep.subr.bf16.mxu0 %v3740_v5  ;;  %v3795_v5 = vld [vmem:[%s4732_s1 + $0x620] sm:$0xff]  }
  0x9e   :  { %3439 = vmatpush3.bf16.msra.mxu1 %v3739_v2  ;;  %v3792_v2 = vld [vmem:[%s4732_s1 + $0x698] sm:$0xff]  }
  0x9f   :  { %3440 = vmatprep.subr.bf16.mxu1 %v3741_v6  ;;  %v3796_v6 = vld [vmem:[%s4732_s1 + $0x6a0] sm:$0xff]  }
  0xa0   :  { %3419 = vmatpush3.bf16.msra.mxu0 %v3742_v9  ;;  %v3799_v9 = vld [vmem:[%s4732_s1 + $0x628] sm:$0xff]  }
  0xa1   :  { %3448 = vmatprep.subr.bf16.mxu0 %v3744_v13  ;;  %v3802_v13 = vld [vmem:[%s4732_s1 + $0x6f0] sm:$0xff]  }
  0xa2   :  { %3441 = vmatpush3.bf16.msra.mxu1 %v3743_v10  ;;  %v3800_v10 = vld [vmem:[%s4732_s1 + $0x6a8] sm:$0xff]  }
  0xa3   :  { %2667 = vmatmul.mubr.bf16.vlgmr.msra.gmra.mrb[16].mxu0 %v671_v12  ;;  %3470 = vmatprep.subr.bf16.mxu1 %v3745_v14  ;;  %v33_v12 = vld [vmem:[%s4731_s0 + $0x18] sm:$0xff] }
  0xa4   :  { %3449 = vmatpush3.bf16.msra.mxu0 %v3746_v16  ;;  %2746 = vmatprep.mubr.bf16.mxu0 %v692_v15  ;;  %v704_v14 = vrot.slane %v33_v12, %v3993_v41  ;;  %v697_v15 = vcombine.high %v33_v12, %v33_v12  ;;  %v3803_v16 = vld [vmem:[%s4732_s1 + $0x630] sm:$0xff]  }
  0xa5   :  { %2707 = vmatmul.mubr.bf16.vlgmr.msra.gmra.mrb[16].mxu1 %v693_v18  ;;  %3450 = vmatprep.subr.bf16.mxu0 %v3748_v19 }
  0xa6   :  { %3471 = vmatpush3.bf16.msra.mxu1 %v3747_v17  ;;  %2786 = vmatprep.mubr.bf16.mxu1 %v696_v21  ;;  %v3805_v17 = vld [vmem:[%s4732_s1 + $0x678] sm:$0xff]   ;;  %v712_v18 = vcombine.high %v704_v14, %v704_v14  ;;  %v4597_v19 = vrot.slane %v697_v15, %v3993_v41 }
  0xa7   :  { %3472 = vmatprep.subr.bf16.mxu1 %v3749_v20  ;;  %v3804_v20 = vld [vmem:[%s4732_s1 + $0x6b0] sm:$0xff]   ;;  %v3806_v21 = vld [vmem:[%s4732_s1 + $0x6f8] sm:$0xff]  }
  0xa8   :  { %3451 = vmatpush3.bf16.msra.mxu0 %v3750_v22  ;;  %v734_v22 = vrot.slane %v712_v18, %v3993_v41 }
  0xa9   :  { %3452 = vmatprep.subr.bf16.mxu0 %v3752_v24  ;;  %v3807_v24 = vld [vmem:[%s4732_s1 + $0x638] sm:$0xff]  }
  0xaa   :  { %3473 = vmatpush3.bf16.msra.mxu1 %v3751_v23  ;;  %v713_v23 = vcombine.high %v4597_v19, %v4597_v19 }
  0xab   :  { %3474 = vmatprep.subr.bf16.mxu1 %v3753_v25  ;;  %v744_v25 = vcombine.high %v734_v22, %v734_v22 }
  0xac   :  { %3453 = vmatpush3.bf16.msra.mxu0 %v3754_v26  ;;  %v720_v26 = vrot.slane %v704_v14, %v3993_v41 }
  0xad   :  { %3454 = vmatprep.subr.bf16.mxu0 %v3756_v28  ;;  %v3808_v28 = vld [vmem:[%s4732_s1 + $0x6b8] sm:$0xff]  }
  0xae   :  { %3475 = vmatpush3.bf16.msra.mxu1 %v3755_v27  ;;  %v3809_v27 = vld [vmem:[%s4732_s1 + $0x740] sm:$0xff]  }
  0xaf   :  { %3476 = vmatprep.subr.bf16.mxu1 %v3757_v29  ;;  %v741_v29 = vrot.slane %v713_v23, %v3993_v41 }
  0xb0   :  { %3455 = vmatpush3.bf16.msra.mxu0 %v3758_v30  ;;  %v3810_v30 = vld [vmem:[%s4732_s1 + $0x7c0] sm:$0xff]  }
  0xb1   :  { %3456 = vmatprep.subr.bf16.mxu0 %v3760_v32  ;;  %v742_v32 = vcombine.high %v720_v26, %v720_v26 }
  0xb2   :  { %3477 = vmatpush3.bf16.msra.mxu1 %v3759_v31  ;;  %v3811_v31 = vld [vmem:[%s4732_s1 + $0x700] sm:$0xff]  }
  0xb3   :  { %3478 = vmatprep.subr.bf16.mxu1 %v3761_v33  ;;  %v3813_v33 = vld [vmem:[%s4732_s1 + $0x748] sm:$0xff]  }
  0xb4   :  { %3457 = vmatpush3.bf16.msra.mxu0 %v3762_v34  ;;  %v3812_v34 = vld [vmem:[%s4732_s1 + $0x780] sm:$0xff]  }
  0xb5   :  { %3458 = vmatprep.subr.bf16.mxu0 %v3764_v36  ;;  %v3814_v36 = vld [vmem:[%s4732_s1 + $0x7c8] sm:$0xff]  }
  0xb6   :  { %3479 = vmatpush3.bf16.msra.mxu1 %v3763_v35  ;;  %v745_v35 = vcombine.high %v741_v29, %v741_v29 }
  0xb7   :  { %3480 = vmatprep.subr.bf16.mxu1 %v3765_v37  ;;  %v3815_v37 = vld [vmem:[%s4732_s1 + $0x708] sm:$0xff]  }
  0xb8   :  { %3459 = vmatpush3.bf16.msra.mxu0 %v3766_v38  ;;  %v3817_v38 = vld [vmem:[%s4732_s1 + $0x750] sm:$0xff]  }
  0xb9   :  { %3460 = vmatprep.subr.bf16.mxu0 %v3768_v40  ;;  %v3818_v40 = vld [vmem:[%s4732_s1 + $0x7d0] sm:$0xff]  }
  0xba   :  { %3481 = vmatpush3.bf16.msra.mxu1 %v3767_v39  ;;  %v3816_v39 = vld [vmem:[%s4732_s1 + $0x788] sm:$0xff]  }
  0xbb   :  { %3482 = vmatprep.subr.bf16.mxu1 %v3769_v42  ;;  %v3819_v42 = vld [vmem:[%s4732_s1 + $0x710] sm:$0xff]  }
  0xbc   :  { %3461 = vmatpush3.bf16.msra.mxu0 %v3770_v43  ;;  %v3821_v43 = vld [vmem:[%s4732_s1 + $0x758] sm:$0xff]  }
  0xbd   :  { %3462 = vmatprep.subr.bf16.mxu0 %v3772_v45  ;;  %v3822_v45 = vld [vmem:[%s4732_s1 + $0x7d8] sm:$0xff]  }
  0xbe   :  { %3483 = vmatpush3.bf16.msra.mxu1 %v3771_v44  ;;  %v3820_v44 = vld [vmem:[%s4732_s1 + $0x790] sm:$0xff]  }
  0xbf   :  { %3484 = vmatprep.subr.bf16.mxu1 %v3773_v46  ;;  %v3823_v46 = vld [vmem:[%s4732_s1 + $0x718] sm:$0xff]  }
  0xc0   :  { %3463 = vmatpush3.bf16.msra.mxu0 %v3774_v47  ;;  %v3825_v47 = vld [vmem:[%s4732_s1 + $0x760] sm:$0xff]  }
  0xc1   :  { %3492 = vmatprep.subr.bf16.mxu0 %v3777_v50  ;;  %v3827_v50 = vld [vmem:[%s4732_s1 + $0x720] sm:$0xff]  }
  0xc2   :  { %3485 = vmatpush3.bf16.msra.mxu1 %v3775_v48  ;;  %v3824_v48 = vld [vmem:[%s4732_s1 + $0x798] sm:$0xff]  }
  0xc3   :  { %2747 = vmatmul.mubr.bf16.vlgmr.msra.gmra.mrb[20].mxu0 %v678_v49  ;;  %3514 = vmatprep.subr.bf16.mxu1 %v3778_v51  ;;  %v3826_v49 = vld [vmem:[%s4732_s1 + $0x7e0] sm:$0xff]   ;;  %v3829_v51 = vld [vmem:[%s4732_s1 + $0x768] sm:$0xff]  }
  0xc4   :  { %3493 = vmatpush3.bf16.msra.mxu0 %v3779_v52  ;;  %2826 = vmatprep.mubr.bf16.mxu0 %v734_v22  ;;  %v3828_v52 = vld [vmem:[%s4732_s1 + $0x7a0] sm:$0xff]  }
  0xc5   :  { %2787 = vmatmul.mubr.bf16.vlgmr.msra.gmra.mrb[20].mxu1 %v694_v54  ;;  %3494 = vmatprep.subr.bf16.mxu0 %v3781_v55  ;;  %v3831_v54 = vld [vmem:[%s4732_s1 + $0x728] sm:$0xff]   ;;  %v3833_v55 = vld [vmem:[%s4732_s1 + $0x770] sm:$0xff]  }
  0xc6   :  { %3515 = vmatpush3.bf16.msra.mxu1 %v3780_v53  ;;  %2866 = vmatprep.mubr.bf16.mxu1 %v744_v25  ;;  %v3830_v53 = vld [vmem:[%s4732_s1 + $0x7e8] sm:$0xff]  }
  0xc7   :  { %3516 = vmatprep.subr.bf16.mxu1 %v3782_v56 }
  0xc8   :  { %3495 = vmatpush3.bf16.msra.mxu0 %v3783_v57  ;;  %v3832_v57 = vld [vmem:[%s4732_s1 + $0x7a8] sm:$0xff]  }
  0xc9   :  { %3496 = vmatprep.subr.bf16.mxu0 %v3785_v59 }
  0xca   :  { %3517 = vmatpush3.bf16.msra.mxu1 %v3784_v58 }
  0xcb   :  { %3518 = vmatprep.subr.bf16.mxu1 %v3786_v60 }
  0xcc   :  { %3497 = vmatpush3.bf16.msra.mxu0 %v3787_v61 }
  0xcd   :  { %3498 = vmatprep.subr.bf16.mxu0 %v3789_v63 }
  0xce   :  { %3519 = vmatpush3.bf16.msra.mxu1 %v3788_v62 }
  0xcf   :  { %3520 = vmatprep.subr.bf16.mxu1 %v3790_v0 }
  0xd0   :  { %3499 = vmatpush3.bf16.msra.mxu0 %v3791_v1 }
  0xd1   :  { %3500 = vmatprep.subr.bf16.mxu0 %v3793_v3 }
  0xd2   :  { %3521 = vmatpush3.bf16.msra.mxu1 %v3792_v2 }
  0xd3   :  { %3522 = vmatprep.subr.bf16.mxu1 %v3794_v4 }
  0xd4   :  { %3501 = vmatpush3.bf16.msra.mxu0 %v3795_v5 }
  0xd5   :  { %3502 = vmatprep.subr.bf16.mxu0 %v3797_v7 }
  0xd6   :  { %3523 = vmatpush3.bf16.msra.mxu1 %v3796_v6 }
  0xd7   :  { %3524 = vmatprep.subr.bf16.mxu1 %v3798_v8 }
  0xd8   :  { %3503 = vmatpush3.bf16.msra.mxu0 %v3799_v9 }
  0xd9   :  { %3504 = vmatprep.subr.bf16.mxu0 %v3801_v11 }
  0xda   :  { %3525 = vmatpush3.bf16.msra.mxu1 %v3800_v10 }
  0xdb   :  { %3526 = vmatprep.subr.bf16.mxu1 %v3802_v13 }
  0xdc   :  { %3505 = vmatpush3.bf16.msra.mxu0 %v3803_v16 }
  0xdd   :  { %3506 = vmatprep.subr.bf16.mxu0 %v3805_v17 }
  0xde   :  { %3527 = vmatpush3.bf16.msra.mxu1 %v3804_v20 }
  0xdf   :  { %3528 = vmatprep.subr.bf16.mxu1 %v3806_v21 }
  0xe0   :  { %3507 = vmatpush3.bf16.msra.mxu0 %v3807_v24 }
  0xe1   :  { %3536 = vmatprep.subr.bf16.mxu0 %v3809_v27 }
  0xe2   :  { %3529 = vmatpush3.bf16.msra.mxu1 %v3808_v28 }
  0xe3   :  { %2827 = vmatmul.mubr.bf16.vlgmr.msra.gmra.mrb[24].mxu0 %v720_v26  ;;  %3558 = vmatprep.subr.bf16.mxu1 %v3810_v30 }
  0xe4   :  { %3537 = vmatpush3.bf16.msra.mxu0 %v3811_v31  ;;  %2906 = vmatprep.mubr.bf16.mxu0 %v741_v29 }
  0xe5   :  { %2867 = vmatmul.mubr.bf16.vlgmr.msra.gmra.mrb[24].mxu1 %v742_v32  ;;  %3538 = vmatprep.subr.bf16.mxu0 %v3813_v33 }
  0xe6   :  { %3559 = vmatpush3.bf16.msra.mxu1 %v3812_v34  ;;  %2946 = vmatprep.mubr.bf16.mxu1 %v745_v35 }
  0xe7   :  { %3560 = vmatprep.subr.bf16.mxu1 %v3814_v36 }
  0xe8   :  { %3539 = vmatpush3.bf16.msra.mxu0 %v3815_v37 }
  0xe9   :  { %3540 = vmatprep.subr.bf16.mxu0 %v3817_v38 }
  0xea   :  { %3561 = vmatpush3.bf16.msra.mxu1 %v3816_v39 }
  0xeb   :  { %3562 = vmatprep.subr.bf16.mxu1 %v3818_v40 }
  0xec   :  { %3541 = vmatpush3.bf16.msra.mxu0 %v3819_v42 }
  0xed   :  { %3542 = vmatprep.subr.bf16.mxu0 %v3821_v43 }
  0xee   :  { %3563 = vmatpush3.bf16.msra.mxu1 %v3820_v44 }
  0xef   :  { %3564 = vmatprep.subr.bf16.mxu1 %v3822_v45 }
  0xf0   :  { %3543 = vmatpush3.bf16.msra.mxu0 %v3823_v46 }
  0xf1   :  { %3544 = vmatprep.subr.bf16.mxu0 %v3825_v47 }
  0xf2   :  { %3565 = vmatpush3.bf16.msra.mxu1 %v3824_v48 }
  0xf3   :  { %3566 = vmatprep.subr.bf16.mxu1 %v3826_v49 }
  0xf4   :  { %3545 = vmatpush3.bf16.msra.mxu0 %v3827_v50 }
  0xf5   :  { %3546 = vmatprep.subr.bf16.mxu0 %v3829_v51 }
  0xf6   :  { %3567 = vmatpush3.bf16.msra.mxu1 %v3828_v52  ;;  %v3244_v56 = vpop.f32.mrb[0].mxu0 }
  0xf7   :  { %8 = vsyncpa [#allocation3], 0  ;;  %v3245_v58 = vpop.f32.mrb[1].mxu0  ;;  %3568 = vmatprep.subr.bf16.mxu1 %v3830_v53  ;;  %v3834_v59 = vld [vmem:[%s4732_s1 + $0x7f0] sm:$0xff]   ;;  %v3266_v60 = vpop.f32.mrb[0].mxu1  ;;  %v3837_v2 = vld [vmem:[%s4732_s1 + $0x778] sm:$0xff]   ;;  %v727_v10 = vrot.slane %v4597_v19, %v3993_v41 }
  0xf8   :  { %v3246_v61 = vadd.f32 %v3245_v58, %v3244_v56  ;;  %v3247_v62 = vpop.f32.mrb[2].mxu0  ;;  %3547 = vmatpush3.bf16.msra.mxu0 %v3831_v54  ;;  %v3835_v63 = vld [vmem:[%s4732_s1 + $0x730] sm:$0xff]   ;;  %v3267_v0 = vpop.f32.mrb[1].mxu1  ;;  %v3838_v7 = vld [vmem:[%s4732_s1 + $0x7f8] sm:$0xff]   ;;  %v2971_v38 = vld [vmem:[%s4733_s2] ss:$0 sm:$0xff] }
  0xf9   :  { %v3248_v1 = vpop.f32.mrb[3].mxu0  ;;  %3548 = vmatprep.subr.bf16.mxu0 %v3833_v55  ;;  %v3268_v3 = vadd.f32 %v3267_v0, %v3266_v60  ;;  %v3269_v4 = vpop.f32.mrb[2].mxu1  ;;  %v3836_v5 = vld [vmem:[%s4732_s1 + $0x7b0] sm:$0xff]   ;;  %v3839_v9 = vld [vmem:[%s4732_s1 + $0x738] sm:$0xff]   ;;  %v743_v12 = vcombine.high %v727_v10, %v727_v10  ;;  %vm27_vm0 = vcmask 254976   ;;  %s3867_s2 = smov [#allocation2]  }
  0xfa   :  { %3569 = vmatpush3.bf16.msra.mxu1 %v3832_v57  ;;  %v3270_v6 = vpop.f32.mrb[3].mxu1  ;;  %v3840_v11 = vld [vmem:[%s4732_s1 + $0x7b8] sm:$0xff]   ;;  %28 = vst.msk [vmem:[#allocation2] sm:$0x3] %vm27_vm0, %v2971_v38  ;;  %s2963_s17 = sshll.u32 %s3867_s2, 4  ;;  %s2964_s17 = int_to_ptr.vmem [resolvable:$true] %s2963_s17 }
  0xfb   :  { %3570 = vmatprep.subr.bf16.mxu1 %v3834_v59  ;;  %v2389_v8 = vadd.f32 %v3268_v3, %v3246_v61  ;;  %s3842_s18 = scalar_lea.vmem %s2964_s17, 32  ;;  %p3847_p1 = scmp.lt.s32.totalorder %s2964_s17, %s2964_s17 }
  0xfc   :  { %3549 = vmatpush3.bf16.msra.mxu0 %v3835_v63  ;;  %p3843_p0 = scmp.ne.s32.totalorder %s2964_s17, %s3842_s18  ;;  %p3848_p2 = scmp.lt.s32.totalorder %s3842_s18, %s3842_s18 }
  0xfd   :  { %3550 = vmatprep.subr.bf16.mxu0 %v3837_v2 }
  0xfe   :  { %3571 = vmatpush3.bf16.msra.mxu1 %v3836_v5  ;;  %p3849_p3 = por %p3848_p2, %p3847_p1 }
  0xff   :  { %3572 = vmatprep.subr.bf16.mxu1 %v3838_v7 }
 0x100   :  { %3551 = vmatpush3.bf16.msra.mxu0 %v3839_v9  ;;  %p3850_p4 = pnand %p3849_p3, %p3843_p0 }
 0x102   :  { %3573 = vmatpush3.bf16.msra.mxu1 %v3840_v11 }
 0x103   :  { %2907 = vmatmul.mubr.bf16.vlgmr.msra.gmra.mrb[28].mxu0 %v727_v10 }
 0x105   :  { %2947 = vmatmul.mubr.bf16.vlgmr.msra.gmra.mrb[28].mxu1 %v743_v12 }
 0x116   :  { %v3288_v13 = vpop.f32.mrb[4].mxu0 }
 0x117   :  { %v3289_v14 = vpop.f32.mrb[5].mxu0  ;;  %v3310_v15 = vpop.f32.mrb[4].mxu1 }
 0x118   :  { %v3290_v16 = vadd.f32 %v3289_v14, %v3288_v13  ;;  %v3291_v17 = vpop.f32.mrb[6].mxu0  ;;  %v3311_v18 = vpop.f32.mrb[5].mxu1 }
 0x119   :  { %v3292_v20 = vpop.f32.mrb[7].mxu0  ;;  %v3312_v41 = vadd.f32 %v3311_v18, %v3310_v15  ;;  %v3313_v19 = vpop.f32.mrb[6].mxu1 }
 0x11a   :  { %v2429_v21 = vadd.f32 %v3290_v16, %v2389_v8  ;;  %v3314_v22 = vpop.f32.mrb[7].mxu1 }
 0x11c   :  { %v2469_v23 = vadd.f32 %v3312_v41, %v2429_v21 }
 0x136   :  { %v3332_v24 = vpop.f32.mrb[8].mxu0 }
 0x137   :  { %v3333_v25 = vpop.f32.mrb[9].mxu0 }
 0x138   :  { %v3354_v26 = vpop.f32.mrb[8].mxu1  ;;  %v3334_v27 = vadd.f32 %v3333_v25, %v3332_v24  ;;  %v3335_v28 = vpop.f32.mrb[10].mxu0 }
 0x139   :  { %v3355_v29 = vpop.f32.mrb[9].mxu1  ;;  %v3336_v30 = vpop.f32.mrb[11].mxu0 }
 0x13a   :  { %v2509_v31 = vadd.f32 %v3334_v27, %v2469_v23  ;;  %v3356_v32 = vadd.f32 %v3355_v29, %v3354_v26  ;;  %v3357_v33 = vpop.f32.mrb[10].mxu1 }
 0x13b   :  { %v3358_v34 = vpop.f32.mrb[11].mxu1 }
 0x13c   :  { %v2549_v35 = vadd.f32 %v3356_v32, %v2509_v31  ;;  %v29_v31 = vld [vmem:[#allocation2] sm:$0x3] }
 0x156   :  { %v3376_v36 = vpop.f32.mrb[12].mxu0 }
 0x157   :  { %v3377_v37 = vpop.f32.mrb[13].mxu0 }
 0x158   :  { %v3398_v39 = vpop.f32.mrb[12].mxu1  ;;  %v3378_v40 = vadd.f32 %v3377_v37, %v3376_v36  ;;  %v3379_v42 = vpop.f32.mrb[14].mxu0 }
 0x159   :  { %v3399_v43 = vpop.f32.mrb[13].mxu1  ;;  %v3380_v44 = vpop.f32.mrb[15].mxu0 }
 0x15a   :  { %v2589_v45 = vadd.f32 %v3378_v40, %v2549_v35  ;;  %v3400_v46 = vadd.f32 %v3399_v43, %v3398_v39  ;;  %v3401_v47 = vpop.f32.mrb[14].mxu1 }
 0x15b   :  { %v3402_v48 = vpop.f32.mrb[15].mxu1 }
 0x15c   :  { %v2629_v49 = vadd.f32 %v3400_v46, %v2589_v45 }
 0x176   :  { %v3420_v50 = vpop.f32.mrb[16].mxu0 }
 0x177   :  { %v3421_v51 = vpop.f32.mrb[17].mxu0 }
 0x178   :  { %v3442_v52 = vpop.f32.mrb[16].mxu1  ;;  %v3422_v53 = vadd.f32 %v3421_v51, %v3420_v50  ;;  %v3423_v54 = vpop.f32.mrb[18].mxu0 }
 0x179   :  { %v3443_v55 = vpop.f32.mrb[17].mxu1  ;;  %v3424_v56 = vpop.f32.mrb[19].mxu0 }
 0x17a   :  { %v2669_v57 = vadd.f32 %v3422_v53, %v2629_v49  ;;  %v3444_v58 = vadd.f32 %v3443_v55, %v3442_v52  ;;  %v3445_v59 = vpop.f32.mrb[18].mxu1 }
 0x17b   :  { %v3446_v60 = vpop.f32.mrb[19].mxu1 }
 0x17c   :  { %v2709_v61 = vadd.f32 %v3444_v58, %v2669_v57 }
 0x196   :  { %v3464_v62 = vpop.f32.mrb[20].mxu0 }
 0x197   :  { %v3465_v63 = vpop.f32.mrb[21].mxu0 }
 0x198   :  { %v3486_v0 = vpop.f32.mrb[20].mxu1  ;;  %v3466_v1 = vadd.f32 %v3465_v63, %v3464_v62  ;;  %v3467_v2 = vpop.f32.mrb[22].mxu0 }
 0x199   :  { %v3487_v3 = vpop.f32.mrb[21].mxu1  ;;  %v3468_v4 = vpop.f32.mrb[23].mxu0 }
 0x19a   :  { %v2749_v5 = vadd.f32 %v3466_v1, %v2709_v61  ;;  %v3488_v6 = vadd.f32 %v3487_v3, %v3486_v0  ;;  %v3489_v7 = vpop.f32.mrb[22].mxu1 }
 0x19b   :  { %v3490_v8 = vpop.f32.mrb[23].mxu1 }
 0x19c   :  { %v2789_v9 = vadd.f32 %v3488_v6, %v2749_v5 }
 0x1b6   :  { %v3508_v10 = vpop.f32.mrb[24].mxu0 }
 0x1b7   :  { %v3509_v11 = vpop.f32.mrb[25].mxu0 }
 0x1b8   :  { %v3530_v12 = vpop.f32.mrb[24].mxu1  ;;  %v3510_v13 = vadd.f32 %v3509_v11, %v3508_v10  ;;  %v3511_v14 = vpop.f32.mrb[26].mxu0 }
 0x1b9   :  { %v3531_v15 = vpop.f32.mrb[25].mxu1  ;;  %v3512_v16 = vpop.f32.mrb[27].mxu0 }
 0x1ba   :  { %v2829_v17 = vadd.f32 %v3510_v13, %v2789_v9  ;;  %v3532_v18 = vadd.f32 %v3531_v15, %v3530_v12  ;;  %v3533_v20 = vpop.f32.mrb[26].mxu1 }
 0x1bb   :  { %v3534_v21 = vpop.f32.mrb[27].mxu1 }
 0x1bc   :  { %v2869_v41 = vadd.f32 %v3532_v18, %v2829_v17 }
 0x1d6   :  { %v3552_v19 = vpop.f32.mrb[28].mxu0 }
 0x1d7   :  { %v3553_v22 = vpop.f32.mrb[29].mxu0 }
 0x1d8   :  { %v3574_v23 = vpop.f32.mrb[28].mxu1  ;;  %v3554_v24 = vadd.f32 %v3553_v22, %v3552_v19  ;;  %v3555_v25 = vpop.f32.mrb[30].mxu0 }
 0x1d9   :  { %v3575_v26 = vpop.f32.mrb[29].mxu1  ;;  %v3556_v27 = vpop.f32.mrb[31].mxu0 }
 0x1da   :  { %v2909_v28 = vadd.f32 %v3554_v24, %v2869_v41  ;;  %v3576_v29 = vadd.f32 %v3575_v26, %v3574_v23  ;;  %v3577_v30 = vpop.f32.mrb[30].mxu1 }
 0x1db   :  { %v3578_v32 = vpop.f32.mrb[31].mxu1 }
 0x1dc   :  { %v2949_v33 = vadd.f32 %v3576_v29, %v2909_v28 }
 0x1de   :  { %v2954_v34 = vadd.f32 %v2949_v33, %v29_v31 }
 0x1e0   :  { %2956 = vst.msk [vmem:[#allocation2] sm:$0x3] %vm27_vm0, %v2954_v34 }
 0x1e1   :  { %3853 = shalt.err (!%p3850_p4)
}
 0x1e2   :  { %s3854_s21 = scalar_lea.hbm %s4734_s3, 32 }
 0x1e3   :  { %p3855_p5 = scmp.ne.s32.totalorder %s4734_s3, %s3854_s21  ;;  %p3858_p6 = scmp.lt.u32.totalorder %s3854_s21, %s4734_s3 }
 0x1e5   :  { %p3860_p7 = pnand %p3858_p6, %p3855_p5 }
 0x1e7   :  { %3863 = shalt.err (!%p3860_p7)
}
 0x1e8   :  { %2966 = dma.vmem_to_hbm [thread:$0]  %s2964_s17, 32, %s4734_s3, [#allocation3]  }
 0x1e9   :  { %3864 = dma.done.wait [#allocation3], 32  }
 0x1ea   :  { %3865 = vsyncadd [#allocation3], 4294967264 }
 0x1eb   :  { %2970 = vsyncpa [#allocation3], 1 }

</bundles_post_ra>
